<compile_context>
chip_gen: v7x
topology: tpu7x:2x2x1
jax: 0.10.0
libtpu: 0.0.40
codegen_flags: <defaults>
</compile_context>

<pallas_src>
import functools

import jax
import jax.numpy as jnp
from jax.experimental import pallas as pl
from jax.experimental.pallas import tpu as pltpu

EPS = 1e-5           # nn.InstanceNorm1d default
LRELU_SLOPE = 0.01   # nn.LeakyReLU default


# --------------------------- in-kernel helpers -------------------------------
def _leaky_relu(v):
    return jnp.where(v >= 0, v, LRELU_SLOPE * v)


def _norm_and_im2col(x, *, nb, l_in, K, pad, t_vals=None):
    """Per batch segment: (+t) -> InstanceNorm1d -> zero-pad -> im2col.

    x      : (C, nb*l_in) f32; batch element b occupies lanes [b*l_in, (b+1)*l_in).
    t_vals : optional list of nb scalars (time_info) added before the norm.
    Returns the conv matmul RHS of shape (K*C, nb*l_out), row order k*C + c,
    which matches the (C_out, K*C_in) weight layout prepared host-side.
    """
    c = x.shape[0]
    l_out = l_in + 2 * pad - (K - 1)
    zpad = jnp.zeros((c, pad), jnp.float32) if pad > 0 else None
    cols = []
    for b in range(nb):                                   # static, nb is small
        s = x if nb == 1 else x[:, b * l_in:(b + 1) * l_in]
        if t_vals is not None:
            s = s + t_vals[b]                             # y + time_info
        # InstanceNorm1d (affine=False): two-pass variance, rsqrt on the EUP.
        mean = jnp.mean(s, axis=-1, keepdims=True)
        d = s - mean
        var = jnp.mean(d * d, axis=-1, keepdims=True)
        sn = d * jax.lax.rsqrt(var + EPS)
        xp = sn if zpad is None else jnp.concatenate([zpad, sn, zpad], axis=1)
        # K shifted views stacked along the contraction axis -> ONE deep matmul.
        cols.append(jnp.concatenate([xp[:, k:k + l_out] for k in range(K)], axis=0))
    return cols[0] if nb == 1 else jnp.concatenate(cols, axis=1)


# --------------------------- fused full-chain kernel -------------------------
def _decoder_chain_kernel(*refs, n_layers, nb, K, pad1, lens):
    """One grid step: nb batch elements, the complete decoder chain."""
    y_ref, t_ref = refs[0], refs[1]
    w_refs = refs[2:2 + 4 * n_layers]
    skip_refs = refs[2 + 4 * n_layers:2 + 4 * n_layers + (n_layers - 1)]
    o_ref = refs[-1]

    base = pl.program_id(0) * nb
    t_vals = [t_ref[base + b] for b in range(nb)]          # SMEM scalar reads

    y = y_ref[0].astype(jnp.float32)                       # (C0, nb*L0)
    for i in range(n_layers):                              # unrolled at trace time
        last = i == n_layers - 1
        w1 = w_refs[4 * i][...]
        b1 = w_refs[4 * i + 1][...]
        w2 = w_refs[4 * i + 2][...]
        b2 = w_refs[4 * i + 3][...]

        # (y + time_info) -> InstanceNorm -> Conv1d(pad=fold_rate) -> LeakyReLU
        m = _norm_and_im2col(y, nb=nb, l_in=lens[i], K=K, pad=pad1, t_vals=t_vals)
        h = jnp.dot(w1, m, preferred_element_type=jnp.float32) + b1
        h = _leaky_relu(h)

        # InstanceNorm -> Conv1d(pad=1) -> LeakyReLU (Identity on the last layer)
        m = _norm_and_im2col(h, nb=nb, l_in=lens[i + 1], K=K, pad=1)
        y = jnp.dot(w2, m, preferred_element_type=jnp.float32) + b2
        if not last:
            y = _leaky_relu(y) + skip_refs[i][0].astype(jnp.float32)   # `+ x[2 - i]`

    o_ref[0] = y.astype(o_ref.dtype)


# --------------------------------- wrapper -----------------------------------
def _choose_nb(n, l_last):
    """Batch elements packed (into lanes) per grid step.

    Largest nb such that nb | n and at least two grid steps remain when n >= 2
    (v7x has two TensorCores; only a parallel grid axis lets both be used).
    Stop growing once the output lane width is already dense.  The per-step
    working set here is a few KB, far below v7x's 64 MiB VMEM.
    """
    best = 1
    for nb in range(1, n + 1):
        if n % nb:
            continue
        if n >= 2 and n // nb < 2:
            continue
        best = nb
        if nb * l_last >= 512:
            break
    return best


def decoder_chain(x, time_info, params, *, fold_rate, kernal_size):
    """Runs the whole decoder path (all layers) as ONE pallas_call.

    x : list of tensors, x[-1] is the decoder input (N, C0, L0); x[2 - i] are
        the skip tensors, exactly as in the reference forward().
    Returns the final decoder output (N, C_last, L_last).
    """
    K = kernal_size
    assert K == 3, "conv2 padding=1 in the PyTorch module assumes kernel size 3"
    n_layers = len(params)
    y0 = x[-1]
    n, c0, l0 = y0.shape
    grow = 2 * fold_rate - (K - 1)
    lens = tuple(l0 + i * grow for i in range(n_layers + 1))
    c_last = params[-1][2].shape[0]

    nb = _choose_nb(n, lens[-1])
    g = n // nb

    def pack(a, l):
        # (N, C, L) -> (G, C, nb*L): batch packed into the lane dim of each block.
        c = a.shape[1]
        return a.reshape(g, nb, c, l).transpose(0, 2, 1, 3).reshape(g, c, nb * l)

    args = [pack(y0, l0), time_info.reshape(n).astype(jnp.float32)]
    in_specs = [
        pl.BlockSpec((1, c0, nb * l0), lambda i: (i, 0, 0)),            # y0
        pl.BlockSpec(memory_space=pltpu.MemorySpace.SMEM),              # time scalars
    ]

    # Per-layer weights: (C_out, C_in, K) -> (C_out, K*C_in), f32 (see review:
    # keep f32 operands — MXU is not the bottleneck and it halves the error).
    for (w1, b1, w2, b2) in params:
        c_o1, c_i1, _ = w1.shape
        c_o2, c_i2, _ = w2.shape
        args += [
            jnp.transpose(w1, (0, 2, 1)).reshape(c_o1, K * c_i1).astype(jnp.float32),
            b1.reshape(c_o1, 1).astype(jnp.float32),
            jnp.transpose(w2, (0, 2, 1)).reshape(c_o2, K * c_i2).astype(jnp.float32),
            b2.reshape(c_o2, 1).astype(jnp.float32),
        ]
        in_specs += [
            pl.BlockSpec((c_o1, K * c_i1), lambda i: (0, 0)),
            pl.BlockSpec((c_o1, 1), lambda i: (0, 0)),
            pl.BlockSpec((c_o2, K * c_i2), lambda i: (0, 0)),
            pl.BlockSpec((c_o2, 1), lambda i: (0, 0)),
        ]

    # Skip tensors (same hard-coded x[2 - i] indexing as the reference).
    for li in range(n_layers - 1):
        skip = x[2 - li]
        c_s = skip.shape[1]
        args.append(pack(skip, lens[li + 1]))
        in_specs.append(
            pl.BlockSpec((1, c_s, nb * lens[li + 1]), lambda i: (i, 0, 0)))

    kernel = functools.partial(_decoder_chain_kernel, n_layers=n_layers, nb=nb,
                               K=K, pad1=fold_rate, lens=lens)

    out = pl.pallas_call(
        kernel,
        out_shape=jax.ShapeDtypeStruct((g, c_last, nb * lens[-1]), y0.dtype),
        grid_spec=pltpu.PrefetchScalarGridSpec(
            num_scalar_prefetch=0,
            grid=(g,),
            in_specs=in_specs,
            out_specs=pl.BlockSpec((1, c_last, nb * lens[-1]), lambda i: (i, 0, 0)),
        ),
        # Real VMEM footprint is <1 MiB, so no explicit vmem_limit_bytes is
        # needed; this stays valid on v7x (64 MiB) as well as v5e/v6e (128 MiB).
        compiler_params=pltpu.CompilerParams(dimension_semantics=("parallel",)),
    )(*args)

    # Unpack (G, C, nb*L) -> (N, C, L).
    return out.reshape(g, c_last, nb, lens[-1]).transpose(0, 2, 1, 3).reshape(
        n, c_last, lens[-1])


class ODUnetDecoderPallas:
    """JAX/Pallas re-implementation of ODUnetDecoder (single fused kernel)."""

    def __init__(self, in_dim_list, dec_channel_list, fold_rate, kernal_size, key):
        assert kernal_size == 3
        self.in_dim_list = in_dim_list        # InstanceNorm1d num_features (affine=False -> no params)
        self.dec_channel_list = dec_channel_list
        self.fold_rate = fold_rate
        self.kernal_size = kernal_size
        self.layer_num = len(in_dim_list)
        self.params = []
        for i in range(self.layer_num):
            c_in, c_out = dec_channel_list[i], dec_channel_list[i + 1]
            key, k1, k2, k3, k4 = jax.random.split(key, 5)
            bd1 = 1.0 / (c_in * kernal_size) ** 0.5      # PyTorch Conv1d default init bound
            bd2 = 1.0 / (c_out * kernal_size) ** 0.5
            w1 = jax.random.uniform(k1, (c_out, c_in, kernal_size), jnp.float32, -bd1, bd1)
            b1 = jax.random.uniform(k2, (c_out,), jnp.float32, -bd1, bd1)
            w2 = jax.random.uniform(k3, (c_out, c_out, kernal_size), jnp.float32, -bd2, bd2)
            b2 = jax.random.uniform(k4, (c_out,), jnp.float32, -bd2, bd2)
            self.params.append((w1, b1, w2, b2))

    def decode(self, x, time_info):
        """The value computed by the reference decoder loop (final y)."""
        return decoder_chain(x, time_info, self.params,
                             fold_rate=self.fold_rate, kernal_size=self.kernal_size)

    def __call__(self, x, time_info, **kwargs):
        # Faithful to the reference forward(): the decoder path is evaluated,
        # but the module returns the input list `x` unchanged (quirk preserved).
        self.decode(x, time_info)
        return x


# ---------------- pure-JAX f32 reference (for correctness check) -------------
def _ref_decode(params, fold_rate, x, time_info):
    def norm(u):
        m = u.mean(-1, keepdims=True)
        v = ((u - m) ** 2).mean(-1, keepdims=True)
        return (u - m) / jnp.sqrt(v + EPS)

    def conv(u, w, b, pad):
        o = jax.lax.conv_general_dilated(
            u, w, window_strides=(1,), padding=[(pad, pad)],
            dimension_numbers=('NCH', 'OIH', 'NCH'),
            precision=jax.lax.Precision.HIGHEST)
        return o + b[None, :, None]

    y = x[-1]
    for i, (w1, b1, w2, b2) in enumerate(params):
        last = i == len(params) - 1
        h = conv(norm(y + time_info), w1, b1, fold_rate)
        h = jnp.where(h >= 0, h, LRELU_SLOPE * h)
        y = conv(norm(h), w2, b2, 1)
        if last:
            break
        y = jnp.where(y >= 0, y, LRELU_SLOPE * y) + x[2 - i]
    return y


if __name__ == "__main__":
    key = jax.random.PRNGKey(0)
    k_p, k_t, k0, k1, k2, k3 = jax.random.split(key, 6)

    # 4 decoder layers (matches the hard-coded x[2 - i] skip indexing), tiny dims.
    in_dim_list = [8, 8, 8, 8]
    dec_channel_list = [4, 8, 8, 8, 4]
    fold_rate = 2
    kernal_size = 3
    N, L3 = 4, 16            # N=4 -> 2 grid steps ("parallel") x 2 batch-in-lane elements

    model = ODUnetDecoderPallas(in_dim_list, dec_channel_list, fold_rate, kernal_size, k_p)

    # Conv1d(k=3, pad=fold_rate) grows the length by 2*fold_rate - 2 per layer,
    # so the skip tensors x[2], x[1], x[0] must match those shapes.
    grow = 2 * fold_rate - (kernal_size - 1)
    shapes = [
        (N, dec_channel_list[3], L3 + 3 * grow),   # x[0] : skip of layer 2
        (N, dec_channel_list[2], L3 + 2 * grow),   # x[1] : skip of layer 1
        (N, dec_channel_list[1], L3 + 1 * grow),   # x[2] : skip of layer 0
        (N, dec_channel_list[0], L3),              # x[3] = x[-1] : decoder input
    ]
    x = [jax.random.normal(k, s, jnp.float32) for k, s in zip((k0, k1, k2, k3), shapes)]
    time_info = jax.random.normal(k_t, (N, 1, 1), jnp.float32)

    y = jax.block_until_ready(model.decode(x, time_info))

    y_ref = _ref_decode(model.params, fold_rate, x, time_info)
    assert y.shape == y_ref.shape, (y.shape, y_ref.shape)
    # f32 operands throughout; the tolerance conservatively covers a possible
    # bf16 MXU pass for the f32 matmuls (typical observed error is far smaller).
    assert jnp.allclose(y, y_ref, rtol=2e-2, atol=2e-2), \
        float(jnp.max(jnp.abs(y - y_ref)))

    # Faithful forward(): returns the input list unchanged (reference quirk).
    out = model(x, time_info)
    assert out is x

    print("KERNEL_OK")
</pallas_src>

<mosaic_0001>
module attributes {stable_mosaic.version = 11 : i64} {
  func.func @_decoder_chain_kernel(%arg0: i32, %arg1: memref<1x4x32xf32, #tpu.memory_space<vmem>>, %arg2: memref<4xf32, #tpu.memory_space<smem>>, %arg3: memref<8x12xf32, #tpu.memory_space<vmem>>, %arg4: memref<8x1xf32, #tpu.memory_space<vmem>>, %arg5: memref<8x24xf32, #tpu.memory_space<vmem>>, %arg6: memref<8x1xf32, #tpu.memory_space<vmem>>, %arg7: memref<8x24xf32, #tpu.memory_space<vmem>>, %arg8: memref<8x1xf32, #tpu.memory_space<vmem>>, %arg9: memref<8x24xf32, #tpu.memory_space<vmem>>, %arg10: memref<8x1xf32, #tpu.memory_space<vmem>>, %arg11: memref<8x24xf32, #tpu.memory_space<vmem>>, %arg12: memref<8x1xf32, #tpu.memory_space<vmem>>, %arg13: memref<8x24xf32, #tpu.memory_space<vmem>>, %arg14: memref<8x1xf32, #tpu.memory_space<vmem>>, %arg15: memref<4x24xf32, #tpu.memory_space<vmem>>, %arg16: memref<4x1xf32, #tpu.memory_space<vmem>>, %arg17: memref<4x12xf32, #tpu.memory_space<vmem>>, %arg18: memref<4x1xf32, #tpu.memory_space<vmem>>, %arg19: memref<1x8x36xf32, #tpu.memory_space<vmem>>, %arg20: memref<1x8x40xf32, #tpu.memory_space<vmem>>, %arg21: memref<1x8x44xf32, #tpu.memory_space<vmem>>, %arg22: memref<1x4x48xf32, #tpu.memory_space<vmem>>) attributes {dimension_semantics = [#tpu.dimension_semantics<parallel>], iteration_bounds = array<i64: 2>, scalar_prefetch = 0 : i64, scratch_operands = 0 : i64, tpu.core_type = #tpu.core_type<tc>, window_params = [{transform_indices = @transform_0, window_bounds = array<i64: 1, 4, 32>}, {transform_indices = @transform_1, window_bounds = array<i64: 4>}, {pipeline_mode = #tpu.pipeline_mode<synchronous>, transform_indices = @transform_2, window_bounds = array<i64: 8, 12>}, {pipeline_mode = #tpu.pipeline_mode<synchronous>, transform_indices = @transform_3, window_bounds = array<i64: 8, 1>}, {pipeline_mode = #tpu.pipeline_mode<synchronous>, transform_indices = @transform_4, window_bounds = array<i64: 8, 24>}, {pipeline_mode = #tpu.pipeline_mode<synchronous>, transform_indices = @transform_5, window_bounds = array<i64: 8, 1>}, {pipeline_mode = #tpu.pipeline_mode<synchronous>, transform_indices = @transform_6, window_bounds = array<i64: 8, 24>}, {pipeline_mode = #tpu.pipeline_mode<synchronous>, transform_indices = @transform_7, window_bounds = array<i64: 8, 1>}, {pipeline_mode = #tpu.pipeline_mode<synchronous>, transform_indices = @transform_8, window_bounds = array<i64: 8, 24>}, {pipeline_mode = #tpu.pipeline_mode<synchronous>, transform_indices = @transform_9, window_bounds = array<i64: 8, 1>}, {pipeline_mode = #tpu.pipeline_mode<synchronous>, transform_indices = @transform_10, window_bounds = array<i64: 8, 24>}, {pipeline_mode = #tpu.pipeline_mode<synchronous>, transform_indices = @transform_11, window_bounds = array<i64: 8, 1>}, {pipeline_mode = #tpu.pipeline_mode<synchronous>, transform_indices = @transform_12, window_bounds = array<i64: 8, 24>}, {pipeline_mode = #tpu.pipeline_mode<synchronous>, transform_indices = @transform_13, window_bounds = array<i64: 8, 1>}, {pipeline_mode = #tpu.pipeline_mode<synchronous>, transform_indices = @transform_14, window_bounds = array<i64: 4, 24>}, {pipeline_mode = #tpu.pipeline_mode<synchronous>, transform_indices = @transform_15, window_bounds = array<i64: 4, 1>}, {pipeline_mode = #tpu.pipeline_mode<synchronous>, transform_indices = @transform_16, window_bounds = array<i64: 4, 12>}, {pipeline_mode = #tpu.pipeline_mode<synchronous>, transform_indices = @transform_17, window_bounds = array<i64: 4, 1>}, {transform_indices = @transform_18, window_bounds = array<i64: 1, 8, 36>}, {transform_indices = @transform_19, window_bounds = array<i64: 1, 8, 40>}, {transform_indices = @transform_20, window_bounds = array<i64: 1, 8, 44>}, {transform_indices = @transform_21, window_bounds = array<i64: 1, 4, 48>}]} {
    %c2_i32 = arith.constant 2 : i32
    %0 = arith.muli %arg0, %c2_i32 : i32
    %c0_i32 = arith.constant 0 : i32
    %1 = arith.addi %0, %c0_i32 : i32
    %2 = arith.index_cast %1 : i32 to index
    %3 = memref.load %arg2[%2] : memref<4xf32, #tpu.memory_space<smem>>
    %c1_i32 = arith.constant 1 : i32
    %4 = arith.addi %0, %c1_i32 : i32
    %5 = arith.index_cast %4 : i32 to index
    %6 = memref.load %arg2[%5] : memref<4xf32, #tpu.memory_space<smem>>
    %c0 = arith.constant 0 : index
    %c0_0 = arith.constant 0 : index
    %c0_1 = arith.constant 0 : index
    %7 = vector.load %arg1[%c0, %c0_0, %c0_1] : memref<1x4x32xf32, #tpu.memory_space<vmem>>, vector<1x4x32xf32>
    %8 = vector.shape_cast %7 : vector<1x4x32xf32> to vector<4x32xf32>
    %c0_2 = arith.constant 0 : index
    %c0_3 = arith.constant 0 : index
    %9 = vector.load %arg3[%c0_2, %c0_3] : memref<8x12xf32, #tpu.memory_space<vmem>>, vector<8x12xf32>
    %c0_4 = arith.constant 0 : index
    %c0_5 = arith.constant 0 : index
    %10 = vector.load %arg4[%c0_4, %c0_5] : memref<8x1xf32, #tpu.memory_space<vmem>>, vector<8x1xf32>
    %c0_6 = arith.constant 0 : index
    %c0_7 = arith.constant 0 : index
    %11 = vector.load %arg5[%c0_6, %c0_7] : memref<8x24xf32, #tpu.memory_space<vmem>>, vector<8x24xf32>
    %c0_8 = arith.constant 0 : index
    %c0_9 = arith.constant 0 : index
    %12 = vector.load %arg6[%c0_8, %c0_9] : memref<8x1xf32, #tpu.memory_space<vmem>>, vector<8x1xf32>
    %cst = arith.constant 0.000000e+00 : f32
    %13 = vector.broadcast %cst : f32 to vector<4x2xf32>
    %14 = vector.extract_strided_slice %8 {offsets = [0, 0], sizes = [4, 16], strides = [1, 1]} : vector<4x32xf32> to vector<4x16xf32>
    %15 = vector.broadcast %3 : f32 to vector<4x16xf32>
    %16 = arith.addf %14, %15 : vector<4x16xf32>
    %cst_10 = arith.constant dense<0.000000e+00> : vector<4xf32>
    %17 = vector.multi_reduction <add>, %16, %cst_10 [1] : vector<4x16xf32> to vector<4xf32>
    %18 = vector.shape_cast %17 : vector<4xf32> to vector<4x1xf32>
    %cst_11 = arith.constant 1.600000e+01 : f32
    %19 = vector.broadcast %cst_11 : f32 to vector<4x1xf32>
    %20 = arith.divf %18, %19 : vector<4x1xf32>
    %21 = vector.broadcast %20 : vector<4x1xf32> to vector<4x16xf32>
    %22 = arith.subf %16, %21 : vector<4x16xf32>
    %23 = arith.mulf %22, %22 : vector<4x16xf32>
    %cst_12 = arith.constant dense<0.000000e+00> : vector<4xf32>
    %24 = vector.multi_reduction <add>, %23, %cst_12 [1] : vector<4x16xf32> to vector<4xf32>
    %25 = vector.shape_cast %24 : vector<4xf32> to vector<4x1xf32>
    %cst_13 = arith.constant 1.600000e+01 : f32
    %26 = vector.broadcast %cst_13 : f32 to vector<4x1xf32>
    %27 = arith.divf %25, %26 : vector<4x1xf32>
    %cst_14 = arith.constant 9.99999974E-6 : f32
    %28 = vector.broadcast %cst_14 : f32 to vector<4x1xf32>
    %29 = arith.addf %27, %28 : vector<4x1xf32>
    %30 = math.rsqrt %29 : vector<4x1xf32>
    %31 = vector.broadcast %30 : vector<4x1xf32> to vector<4x16xf32>
    %32 = arith.mulf %22, %31 : vector<4x16xf32>
    %33 = tpu.concatenate %13, %32, %13 in 1 : vector<4x2xf32>, vector<4x16xf32>, vector<4x2xf32> -> vector<4x20xf32>
    %34 = vector.extract_strided_slice %33 {offsets = [0, 0], sizes = [4, 18], strides = [1, 1]} : vector<4x20xf32> to vector<4x18xf32>
    %35 = vector.extract_strided_slice %33 {offsets = [0, 1], sizes = [4, 18], strides = [1, 1]} : vector<4x20xf32> to vector<4x18xf32>
    %36 = vector.extract_strided_slice %33 {offsets = [0, 2], sizes = [4, 18], strides = [1, 1]} : vector<4x20xf32> to vector<4x18xf32>
    %37 = tpu.concatenate %34, %35, %36 in 0 : vector<4x18xf32>, vector<4x18xf32>, vector<4x18xf32> -> vector<12x18xf32>
    %38 = vector.extract_strided_slice %8 {offsets = [0, 16], sizes = [4, 16], strides = [1, 1]} : vector<4x32xf32> to vector<4x16xf32>
    %39 = vector.broadcast %6 : f32 to vector<4x16xf32>
    %40 = arith.addf %38, %39 : vector<4x16xf32>
    %cst_15 = arith.constant dense<0.000000e+00> : vector<4xf32>
    %41 = vector.multi_reduction <add>, %40, %cst_15 [1] : vector<4x16xf32> to vector<4xf32>
    %42 = vector.shape_cast %41 : vector<4xf32> to vector<4x1xf32>
    %cst_16 = arith.constant 1.600000e+01 : f32
    %43 = vector.broadcast %cst_16 : f32 to vector<4x1xf32>
    %44 = arith.divf %42, %43 : vector<4x1xf32>
    %45 = vector.broadcast %44 : vector<4x1xf32> to vector<4x16xf32>
    %46 = arith.subf %40, %45 : vector<4x16xf32>
    %47 = arith.mulf %46, %46 : vector<4x16xf32>
    %cst_17 = arith.constant dense<0.000000e+00> : vector<4xf32>
    %48 = vector.multi_reduction <add>, %47, %cst_17 [1] : vector<4x16xf32> to vector<4xf32>
    %49 = vector.shape_cast %48 : vector<4xf32> to vector<4x1xf32>
    %cst_18 = arith.constant 1.600000e+01 : f32
    %50 = vector.broadcast %cst_18 : f32 to vector<4x1xf32>
    %51 = arith.divf %49, %50 : vector<4x1xf32>
    %cst_19 = arith.constant 9.99999974E-6 : f32
    %52 = vector.broadcast %cst_19 : f32 to vector<4x1xf32>
    %53 = arith.addf %51, %52 : vector<4x1xf32>
    %54 = math.rsqrt %53 : vector<4x1xf32>
    %55 = vector.broadcast %54 : vector<4x1xf32> to vector<4x16xf32>
    %56 = arith.mulf %46, %55 : vector<4x16xf32>
    %57 = tpu.concatenate %13, %56, %13 in 1 : vector<4x2xf32>, vector<4x16xf32>, vector<4x2xf32> -> vector<4x20xf32>
    %58 = vector.extract_strided_slice %57 {offsets = [0, 0], sizes = [4, 18], strides = [1, 1]} : vector<4x20xf32> to vector<4x18xf32>
    %59 = vector.extract_strided_slice %57 {offsets = [0, 1], sizes = [4, 18], strides = [1, 1]} : vector<4x20xf32> to vector<4x18xf32>
    %60 = vector.extract_strided_slice %57 {offsets = [0, 2], sizes = [4, 18], strides = [1, 1]} : vector<4x20xf32> to vector<4x18xf32>
    %61 = tpu.concatenate %58, %59, %60 in 0 : vector<4x18xf32>, vector<4x18xf32>, vector<4x18xf32> -> vector<12x18xf32>
    %62 = tpu.concatenate %37, %61 in 1 : vector<12x18xf32>, vector<12x18xf32> -> vector<12x36xf32>
    %cst_20 = arith.constant dense<0.000000e+00> : vector<8x36xf32>
    %63 = tpu.matmul %9, %62, %cst_20 {dimension_numbers = #tpu.dot_dimension_numbers<[1], [0], [0], [1], [0, 0, 1, 1], [], []>} : vector<8x12xf32>, vector<12x36xf32>, vector<8x36xf32> -> vector<8x36xf32>
    %64 = vector.broadcast %10 : vector<8x1xf32> to vector<8x36xf32>
    %65 = arith.addf %63, %64 : vector<8x36xf32>
    %cst_21 = arith.constant 0.000000e+00 : f32
    %66 = vector.broadcast %cst_21 : f32 to vector<8x36xf32>
    %67 = arith.cmpf oge, %65, %66 : vector<8x36xf32>
    %cst_22 = arith.constant 0.00999999977 : f32
    %68 = vector.broadcast %cst_22 : f32 to vector<8x36xf32>
    %69 = arith.mulf %68, %65 : vector<8x36xf32>
    %70 = arith.select %67, %65, %69 : vector<8x36xi1>, vector<8x36xf32>
    %cst_23 = arith.constant 0.000000e+00 : f32
    %71 = vector.broadcast %cst_23 : f32 to vector<8x1xf32>
    %72 = vector.extract_strided_slice %70 {offsets = [0, 0], sizes = [8, 18], strides = [1, 1]} : vector<8x36xf32> to vector<8x18xf32>
    %cst_24 = arith.constant dense<0.000000e+00> : vector<8xf32>
    %73 = vector.multi_reduction <add>, %72, %cst_24 [1] : vector<8x18xf32> to vector<8xf32>
    %74 = vector.shape_cast %73 : vector<8xf32> to vector<8x1xf32>
    %cst_25 = arith.constant 1.800000e+01 : f32
    %75 = vector.broadcast %cst_25 : f32 to vector<8x1xf32>
    %76 = arith.divf %74, %75 : vector<8x1xf32>
    %77 = vector.broadcast %76 : vector<8x1xf32> to vector<8x18xf32>
    %78 = arith.subf %72, %77 : vector<8x18xf32>
    %79 = arith.mulf %78, %78 : vector<8x18xf32>
    %cst_26 = arith.constant dense<0.000000e+00> : vector<8xf32>
    %80 = vector.multi_reduction <add>, %79, %cst_26 [1] : vector<8x18xf32> to vector<8xf32>
    %81 = vector.shape_cast %80 : vector<8xf32> to vector<8x1xf32>
    %cst_27 = arith.constant 1.800000e+01 : f32
    %82 = vector.broadcast %cst_27 : f32 to vector<8x1xf32>
    %83 = arith.divf %81, %82 : vector<8x1xf32>
    %cst_28 = arith.constant 9.99999974E-6 : f32
    %84 = vector.broadcast %cst_28 : f32 to vector<8x1xf32>
    %85 = arith.addf %83, %84 : vector<8x1xf32>
    %86 = math.rsqrt %85 : vector<8x1xf32>
    %87 = vector.broadcast %86 : vector<8x1xf32> to vector<8x18xf32>
    %88 = arith.mulf %78, %87 : vector<8x18xf32>
    %89 = tpu.concatenate %71, %88, %71 in 1 : vector<8x1xf32>, vector<8x18xf32>, vector<8x1xf32> -> vector<8x20xf32>
    %90 = vector.extract_strided_slice %89 {offsets = [0, 0], sizes = [8, 18], strides = [1, 1]} : vector<8x20xf32> to vector<8x18xf32>
    %91 = vector.extract_strided_slice %89 {offsets = [0, 1], sizes = [8, 18], strides = [1, 1]} : vector<8x20xf32> to vector<8x18xf32>
    %92 = vector.extract_strided_slice %89 {offsets = [0, 2], sizes = [8, 18], strides = [1, 1]} : vector<8x20xf32> to vector<8x18xf32>
    %93 = tpu.concatenate %90, %91, %92 in 0 : vector<8x18xf32>, vector<8x18xf32>, vector<8x18xf32> -> vector<24x18xf32>
    %94 = vector.extract_strided_slice %70 {offsets = [0, 18], sizes = [8, 18], strides = [1, 1]} : vector<8x36xf32> to vector<8x18xf32>
    %cst_29 = arith.constant dense<0.000000e+00> : vector<8xf32>
    %95 = vector.multi_reduction <add>, %94, %cst_29 [1] : vector<8x18xf32> to vector<8xf32>
    %96 = vector.shape_cast %95 : vector<8xf32> to vector<8x1xf32>
    %cst_30 = arith.constant 1.800000e+01 : f32
    %97 = vector.broadcast %cst_30 : f32 to vector<8x1xf32>
    %98 = arith.divf %96, %97 : vector<8x1xf32>
    %99 = vector.broadcast %98 : vector<8x1xf32> to vector<8x18xf32>
    %100 = arith.subf %94, %99 : vector<8x18xf32>
    %101 = arith.mulf %100, %100 : vector<8x18xf32>
    %cst_31 = arith.constant dense<0.000000e+00> : vector<8xf32>
    %102 = vector.multi_reduction <add>, %101, %cst_31 [1] : vector<8x18xf32> to vector<8xf32>
    %103 = vector.shape_cast %102 : vector<8xf32> to vector<8x1xf32>
    %cst_32 = arith.constant 1.800000e+01 : f32
    %104 = vector.broadcast %cst_32 : f32 to vector<8x1xf32>
    %105 = arith.divf %103, %104 : vector<8x1xf32>
    %cst_33 = arith.constant 9.99999974E-6 : f32
    %106 = vector.broadcast %cst_33 : f32 to vector<8x1xf32>
    %107 = arith.addf %105, %106 : vector<8x1xf32>
    %108 = math.rsqrt %107 : vector<8x1xf32>
    %109 = vector.broadcast %108 : vector<8x1xf32> to vector<8x18xf32>
    %110 = arith.mulf %100, %109 : vector<8x18xf32>
    %111 = tpu.concatenate %71, %110, %71 in 1 : vector<8x1xf32>, vector<8x18xf32>, vector<8x1xf32> -> vector<8x20xf32>
    %112 = vector.extract_strided_slice %111 {offsets = [0, 0], sizes = [8, 18], strides = [1, 1]} : vector<8x20xf32> to vector<8x18xf32>
    %113 = vector.extract_strided_slice %111 {offsets = [0, 1], sizes = [8, 18], strides = [1, 1]} : vector<8x20xf32> to vector<8x18xf32>
    %114 = vector.extract_strided_slice %111 {offsets = [0, 2], sizes = [8, 18], strides = [1, 1]} : vector<8x20xf32> to vector<8x18xf32>
    %115 = tpu.concatenate %112, %113, %114 in 0 : vector<8x18xf32>, vector<8x18xf32>, vector<8x18xf32> -> vector<24x18xf32>
    %116 = tpu.concatenate %93, %115 in 1 : vector<24x18xf32>, vector<24x18xf32> -> vector<24x36xf32>
    %cst_34 = arith.constant dense<0.000000e+00> : vector<8x36xf32>
    %117 = tpu.matmul %11, %116, %cst_34 {dimension_numbers = #tpu.dot_dimension_numbers<[1], [0], [0], [1], [0, 0, 1, 1], [], []>} : vector<8x24xf32>, vector<24x36xf32>, vector<8x36xf32> -> vector<8x36xf32>
    %118 = vector.broadcast %12 : vector<8x1xf32> to vector<8x36xf32>
    %119 = arith.addf %117, %118 : vector<8x36xf32>
    %cst_35 = arith.constant 0.000000e+00 : f32
    %120 = vector.broadcast %cst_35 : f32 to vector<8x36xf32>
    %121 = arith.cmpf oge, %119, %120 : vector<8x36xf32>
    %cst_36 = arith.constant 0.00999999977 : f32
    %122 = vector.broadcast %cst_36 : f32 to vector<8x36xf32>
    %123 = arith.mulf %122, %119 : vector<8x36xf32>
    %124 = arith.select %121, %119, %123 : vector<8x36xi1>, vector<8x36xf32>
    %c0_37 = arith.constant 0 : index
    %c0_38 = arith.constant 0 : index
    %c0_39 = arith.constant 0 : index
    %125 = vector.load %arg19[%c0_37, %c0_38, %c0_39] : memref<1x8x36xf32, #tpu.memory_space<vmem>>, vector<1x8x36xf32>
    %126 = vector.shape_cast %125 : vector<1x8x36xf32> to vector<8x36xf32>
    %127 = arith.addf %124, %126 : vector<8x36xf32>
    %c0_40 = arith.constant 0 : index
    %c0_41 = arith.constant 0 : index
    %128 = vector.load %arg7[%c0_40, %c0_41] : memref<8x24xf32, #tpu.memory_space<vmem>>, vector<8x24xf32>
    %c0_42 = arith.constant 0 : index
    %c0_43 = arith.constant 0 : index
    %129 = vector.load %arg8[%c0_42, %c0_43] : memref<8x1xf32, #tpu.memory_space<vmem>>, vector<8x1xf32>
    %c0_44 = arith.constant 0 : index
    %c0_45 = arith.constant 0 : index
    %130 = vector.load %arg9[%c0_44, %c0_45] : memref<8x24xf32, #tpu.memory_space<vmem>>, vector<8x24xf32>
    %c0_46 = arith.constant 0 : index
    %c0_47 = arith.constant 0 : index
    %131 = vector.load %arg10[%c0_46, %c0_47] : memref<8x1xf32, #tpu.memory_space<vmem>>, vector<8x1xf32>
    %cst_48 = arith.constant 0.000000e+00 : f32
    %132 = vector.broadcast %cst_48 : f32 to vector<8x2xf32>
    %133 = vector.extract_strided_slice %127 {offsets = [0, 0], sizes = [8, 18], strides = [1, 1]} : vector<8x36xf32> to vector<8x18xf32>
    %134 = vector.broadcast %3 : f32 to vector<8x18xf32>
    %135 = arith.addf %133, %134 : vector<8x18xf32>
    %cst_49 = arith.constant dense<0.000000e+00> : vector<8xf32>
    %136 = vector.multi_reduction <add>, %135, %cst_49 [1] : vector<8x18xf32> to vector<8xf32>
    %137 = vector.shape_cast %136 : vector<8xf32> to vector<8x1xf32>
    %cst_50 = arith.constant 1.800000e+01 : f32
    %138 = vector.broadcast %cst_50 : f32 to vector<8x1xf32>
    %139 = arith.divf %137, %138 : vector<8x1xf32>
    %140 = vector.broadcast %139 : vector<8x1xf32> to vector<8x18xf32>
    %141 = arith.subf %135, %140 : vector<8x18xf32>
    %142 = arith.mulf %141, %141 : vector<8x18xf32>
    %cst_51 = arith.constant dense<0.000000e+00> : vector<8xf32>
    %143 = vector.multi_reduction <add>, %142, %cst_51 [1] : vector<8x18xf32> to vector<8xf32>
    %144 = vector.shape_cast %143 : vector<8xf32> to vector<8x1xf32>
    %cst_52 = arith.constant 1.800000e+01 : f32
    %145 = vector.broadcast %cst_52 : f32 to vector<8x1xf32>
    %146 = arith.divf %144, %145 : vector<8x1xf32>
    %cst_53 = arith.constant 9.99999974E-6 : f32
    %147 = vector.broadcast %cst_53 : f32 to vector<8x1xf32>
    %148 = arith.addf %146, %147 : vector<8x1xf32>
    %149 = math.rsqrt %148 : vector<8x1xf32>
    %150 = vector.broadcast %149 : vector<8x1xf32> to vector<8x18xf32>
    %151 = arith.mulf %141, %150 : vector<8x18xf32>
    %152 = tpu.concatenate %132, %151, %132 in 1 : vector<8x2xf32>, vector<8x18xf32>, vector<8x2xf32> -> vector<8x22xf32>
    %153 = vector.extract_strided_slice %152 {offsets = [0, 0], sizes = [8, 20], strides = [1, 1]} : vector<8x22xf32> to vector<8x20xf32>
    %154 = vector.extract_strided_slice %152 {offsets = [0, 1], sizes = [8, 20], strides = [1, 1]} : vector<8x22xf32> to vector<8x20xf32>
    %155 = vector.extract_strided_slice %152 {offsets = [0, 2], sizes = [8, 20], strides = [1, 1]} : vector<8x22xf32> to vector<8x20xf32>
    %156 = tpu.concatenate %153, %154, %155 in 0 : vector<8x20xf32>, vector<8x20xf32>, vector<8x20xf32> -> vector<24x20xf32>
    %157 = vector.extract_strided_slice %127 {offsets = [0, 18], sizes = [8, 18], strides = [1, 1]} : vector<8x36xf32> to vector<8x18xf32>
    %158 = vector.broadcast %6 : f32 to vector<8x18xf32>
    %159 = arith.addf %157, %158 : vector<8x18xf32>
    %cst_54 = arith.constant dense<0.000000e+00> : vector<8xf32>
    %160 = vector.multi_reduction <add>, %159, %cst_54 [1] : vector<8x18xf32> to vector<8xf32>
    %161 = vector.shape_cast %160 : vector<8xf32> to vector<8x1xf32>
    %cst_55 = arith.constant 1.800000e+01 : f32
    %162 = vector.broadcast %cst_55 : f32 to vector<8x1xf32>
    %163 = arith.divf %161, %162 : vector<8x1xf32>
    %164 = vector.broadcast %163 : vector<8x1xf32> to vector<8x18xf32>
    %165 = arith.subf %159, %164 : vector<8x18xf32>
    %166 = arith.mulf %165, %165 : vector<8x18xf32>
    %cst_56 = arith.constant dense<0.000000e+00> : vector<8xf32>
    %167 = vector.multi_reduction <add>, %166, %cst_56 [1] : vector<8x18xf32> to vector<8xf32>
    %168 = vector.shape_cast %167 : vector<8xf32> to vector<8x1xf32>
    %cst_57 = arith.constant 1.800000e+01 : f32
    %169 = vector.broadcast %cst_57 : f32 to vector<8x1xf32>
    %170 = arith.divf %168, %169 : vector<8x1xf32>
    %cst_58 = arith.constant 9.99999974E-6 : f32
    %171 = vector.broadcast %cst_58 : f32 to vector<8x1xf32>
    %172 = arith.addf %170, %171 : vector<8x1xf32>
    %173 = math.rsqrt %172 : vector<8x1xf32>
    %174 = vector.broadcast %173 : vector<8x1xf32> to vector<8x18xf32>
    %175 = arith.mulf %165, %174 : vector<8x18xf32>
    %176 = tpu.concatenate %132, %175, %132 in 1 : vector<8x2xf32>, vector<8x18xf32>, vector<8x2xf32> -> vector<8x22xf32>
    %177 = vector.extract_strided_slice %176 {offsets = [0, 0], sizes = [8, 20], strides = [1, 1]} : vector<8x22xf32> to vector<8x20xf32>
    %178 = vector.extract_strided_slice %176 {offsets = [0, 1], sizes = [8, 20], strides = [1, 1]} : vector<8x22xf32> to vector<8x20xf32>
    %179 = vector.extract_strided_slice %176 {offsets = [0, 2], sizes = [8, 20], strides = [1, 1]} : vector<8x22xf32> to vector<8x20xf32>
    %180 = tpu.concatenate %177, %178, %179 in 0 : vector<8x20xf32>, vector<8x20xf32>, vector<8x20xf32> -> vector<24x20xf32>
    %181 = tpu.concatenate %156, %180 in 1 : vector<24x20xf32>, vector<24x20xf32> -> vector<24x40xf32>
    %cst_59 = arith.constant dense<0.000000e+00> : vector<8x40xf32>
    %182 = tpu.matmul %128, %181, %cst_59 {dimension_numbers = #tpu.dot_dimension_numbers<[1], [0], [0], [1], [0, 0, 1, 1], [], []>} : vector<8x24xf32>, vector<24x40xf32>, vector<8x40xf32> -> vector<8x40xf32>
    %183 = vector.broadcast %129 : vector<8x1xf32> to vector<8x40xf32>
    %184 = arith.addf %182, %183 : vector<8x40xf32>
    %cst_60 = arith.constant 0.000000e+00 : f32
    %185 = vector.broadcast %cst_60 : f32 to vector<8x40xf32>
    %186 = arith.cmpf oge, %184, %185 : vector<8x40xf32>
    %cst_61 = arith.constant 0.00999999977 : f32
    %187 = vector.broadcast %cst_61 : f32 to vector<8x40xf32>
    %188 = arith.mulf %187, %184 : vector<8x40xf32>
    %189 = arith.select %186, %184, %188 : vector<8x40xi1>, vector<8x40xf32>
    %cst_62 = arith.constant 0.000000e+00 : f32
    %190 = vector.broadcast %cst_62 : f32 to vector<8x1xf32>
    %191 = vector.extract_strided_slice %189 {offsets = [0, 0], sizes = [8, 20], strides = [1, 1]} : vector<8x40xf32> to vector<8x20xf32>
    %cst_63 = arith.constant dense<0.000000e+00> : vector<8xf32>
    %192 = vector.multi_reduction <add>, %191, %cst_63 [1] : vector<8x20xf32> to vector<8xf32>
    %193 = vector.shape_cast %192 : vector<8xf32> to vector<8x1xf32>
    %cst_64 = arith.constant 2.000000e+01 : f32
    %194 = vector.broadcast %cst_64 : f32 to vector<8x1xf32>
    %195 = arith.divf %193, %194 : vector<8x1xf32>
    %196 = vector.broadcast %195 : vector<8x1xf32> to vector<8x20xf32>
    %197 = arith.subf %191, %196 : vector<8x20xf32>
    %198 = arith.mulf %197, %197 : vector<8x20xf32>
    %cst_65 = arith.constant dense<0.000000e+00> : vector<8xf32>
    %199 = vector.multi_reduction <add>, %198, %cst_65 [1] : vector<8x20xf32> to vector<8xf32>
    %200 = vector.shape_cast %199 : vector<8xf32> to vector<8x1xf32>
    %cst_66 = arith.constant 2.000000e+01 : f32
    %201 = vector.broadcast %cst_66 : f32 to vector<8x1xf32>
    %202 = arith.divf %200, %201 : vector<8x1xf32>
    %cst_67 = arith.constant 9.99999974E-6 : f32
    %203 = vector.broadcast %cst_67 : f32 to vector<8x1xf32>
    %204 = arith.addf %202, %203 : vector<8x1xf32>
    %205 = math.rsqrt %204 : vector<8x1xf32>
    %206 = vector.broadcast %205 : vector<8x1xf32> to vector<8x20xf32>
    %207 = arith.mulf %197, %206 : vector<8x20xf32>
    %208 = tpu.concatenate %190, %207, %190 in 1 : vector<8x1xf32>, vector<8x20xf32>, vector<8x1xf32> -> vector<8x22xf32>
    %209 = vector.extract_strided_slice %208 {offsets = [0, 0], sizes = [8, 20], strides = [1, 1]} : vector<8x22xf32> to vector<8x20xf32>
    %210 = vector.extract_strided_slice %208 {offsets = [0, 1], sizes = [8, 20], strides = [1, 1]} : vector<8x22xf32> to vector<8x20xf32>
    %211 = vector.extract_strided_slice %208 {offsets = [0, 2], sizes = [8, 20], strides = [1, 1]} : vector<8x22xf32> to vector<8x20xf32>
    %212 = tpu.concatenate %209, %210, %211 in 0 : vector<8x20xf32>, vector<8x20xf32>, vector<8x20xf32> -> vector<24x20xf32>
    %213 = vector.extract_strided_slice %189 {offsets = [0, 20], sizes = [8, 20], strides = [1, 1]} : vector<8x40xf32> to vector<8x20xf32>
    %cst_68 = arith.constant dense<0.000000e+00> : vector<8xf32>
    %214 = vector.multi_reduction <add>, %213, %cst_68 [1] : vector<8x20xf32> to vector<8xf32>
    %215 = vector.shape_cast %214 : vector<8xf32> to vector<8x1xf32>
    %cst_69 = arith.constant 2.000000e+01 : f32
    %216 = vector.broadcast %cst_69 : f32 to vector<8x1xf32>
    %217 = arith.divf %215, %216 : vector<8x1xf32>
    %218 = vector.broadcast %217 : vector<8x1xf32> to vector<8x20xf32>
    %219 = arith.subf %213, %218 : vector<8x20xf32>
    %220 = arith.mulf %219, %219 : vector<8x20xf32>
    %cst_70 = arith.constant dense<0.000000e+00> : vector<8xf32>
    %221 = vector.multi_reduction <add>, %220, %cst_70 [1] : vector<8x20xf32> to vector<8xf32>
    %222 = vector.shape_cast %221 : vector<8xf32> to vector<8x1xf32>
    %cst_71 = arith.constant 2.000000e+01 : f32
    %223 = vector.broadcast %cst_71 : f32 to vector<8x1xf32>
    %224 = arith.divf %222, %223 : vector<8x1xf32>
    %cst_72 = arith.constant 9.99999974E-6 : f32
    %225 = vector.broadcast %cst_72 : f32 to vector<8x1xf32>
    %226 = arith.addf %224, %225 : vector<8x1xf32>
    %227 = math.rsqrt %226 : vector<8x1xf32>
    %228 = vector.broadcast %227 : vector<8x1xf32> to vector<8x20xf32>
    %229 = arith.mulf %219, %228 : vector<8x20xf32>
    %230 = tpu.concatenate %190, %229, %190 in 1 : vector<8x1xf32>, vector<8x20xf32>, vector<8x1xf32> -> vector<8x22xf32>
    %231 = vector.extract_strided_slice %230 {offsets = [0, 0], sizes = [8, 20], strides = [1, 1]} : vector<8x22xf32> to vector<8x20xf32>
    %232 = vector.extract_strided_slice %230 {offsets = [0, 1], sizes = [8, 20], strides = [1, 1]} : vector<8x22xf32> to vector<8x20xf32>
    %233 = vector.extract_strided_slice %230 {offsets = [0, 2], sizes = [8, 20], strides = [1, 1]} : vector<8x22xf32> to vector<8x20xf32>
    %234 = tpu.concatenate %231, %232, %233 in 0 : vector<8x20xf32>, vector<8x20xf32>, vector<8x20xf32> -> vector<24x20xf32>
    %235 = tpu.concatenate %212, %234 in 1 : vector<24x20xf32>, vector<24x20xf32> -> vector<24x40xf32>
    %cst_73 = arith.constant dense<0.000000e+00> : vector<8x40xf32>
    %236 = tpu.matmul %130, %235, %cst_73 {dimension_numbers = #tpu.dot_dimension_numbers<[1], [0], [0], [1], [0, 0, 1, 1], [], []>} : vector<8x24xf32>, vector<24x40xf32>, vector<8x40xf32> -> vector<8x40xf32>
    %237 = vector.broadcast %131 : vector<8x1xf32> to vector<8x40xf32>
    %238 = arith.addf %236, %237 : vector<8x40xf32>
    %cst_74 = arith.constant 0.000000e+00 : f32
    %239 = vector.broadcast %cst_74 : f32 to vector<8x40xf32>
    %240 = arith.cmpf oge, %238, %239 : vector<8x40xf32>
    %cst_75 = arith.constant 0.00999999977 : f32
    %241 = vector.broadcast %cst_75 : f32 to vector<8x40xf32>
    %242 = arith.mulf %241, %238 : vector<8x40xf32>
    %243 = arith.select %240, %238, %242 : vector<8x40xi1>, vector<8x40xf32>
    %c0_76 = arith.constant 0 : index
    %c0_77 = arith.constant 0 : index
    %c0_78 = arith.constant 0 : index
    %244 = vector.load %arg20[%c0_76, %c0_77, %c0_78] : memref<1x8x40xf32, #tpu.memory_space<vmem>>, vector<1x8x40xf32>
    %245 = vector.shape_cast %244 : vector<1x8x40xf32> to vector<8x40xf32>
    %246 = arith.addf %243, %245 : vector<8x40xf32>
    %c0_79 = arith.constant 0 : index
    %c0_80 = arith.constant 0 : index
    %247 = vector.load %arg11[%c0_79, %c0_80] : memref<8x24xf32, #tpu.memory_space<vmem>>, vector<8x24xf32>
    %c0_81 = arith.constant 0 : index
    %c0_82 = arith.constant 0 : index
    %248 = vector.load %arg12[%c0_81, %c0_82] : memref<8x1xf32, #tpu.memory_space<vmem>>, vector<8x1xf32>
    %c0_83 = arith.constant 0 : index
    %c0_84 = arith.constant 0 : index
    %249 = vector.load %arg13[%c0_83, %c0_84] : memref<8x24xf32, #tpu.memory_space<vmem>>, vector<8x24xf32>
    %c0_85 = arith.constant 0 : index
    %c0_86 = arith.constant 0 : index
    %250 = vector.load %arg14[%c0_85, %c0_86] : memref<8x1xf32, #tpu.memory_space<vmem>>, vector<8x1xf32>
    %cst_87 = arith.constant 0.000000e+00 : f32
    %251 = vector.broadcast %cst_87 : f32 to vector<8x2xf32>
    %252 = vector.extract_strided_slice %246 {offsets = [0, 0], sizes = [8, 20], strides = [1, 1]} : vector<8x40xf32> to vector<8x20xf32>
    %253 = vector.broadcast %3 : f32 to vector<8x20xf32>
    %254 = arith.addf %252, %253 : vector<8x20xf32>
    %cst_88 = arith.constant dense<0.000000e+00> : vector<8xf32>
    %255 = vector.multi_reduction <add>, %254, %cst_88 [1] : vector<8x20xf32> to vector<8xf32>
    %256 = vector.shape_cast %255 : vector<8xf32> to vector<8x1xf32>
    %cst_89 = arith.constant 2.000000e+01 : f32
    %257 = vector.broadcast %cst_89 : f32 to vector<8x1xf32>
    %258 = arith.divf %256, %257 : vector<8x1xf32>
    %259 = vector.broadcast %258 : vector<8x1xf32> to vector<8x20xf32>
    %260 = arith.subf %254, %259 : vector<8x20xf32>
    %261 = arith.mulf %260, %260 : vector<8x20xf32>
    %cst_90 = arith.constant dense<0.000000e+00> : vector<8xf32>
    %262 = vector.multi_reduction <add>, %261, %cst_90 [1] : vector<8x20xf32> to vector<8xf32>
    %263 = vector.shape_cast %262 : vector<8xf32> to vector<8x1xf32>
    %cst_91 = arith.constant 2.000000e+01 : f32
    %264 = vector.broadcast %cst_91 : f32 to vector<8x1xf32>
    %265 = arith.divf %263, %264 : vector<8x1xf32>
    %cst_92 = arith.constant 9.99999974E-6 : f32
    %266 = vector.broadcast %cst_92 : f32 to vector<8x1xf32>
    %267 = arith.addf %265, %266 : vector<8x1xf32>
    %268 = math.rsqrt %267 : vector<8x1xf32>
    %269 = vector.broadcast %268 : vector<8x1xf32> to vector<8x20xf32>
    %270 = arith.mulf %260, %269 : vector<8x20xf32>
    %271 = tpu.concatenate %251, %270, %251 in 1 : vector<8x2xf32>, vector<8x20xf32>, vector<8x2xf32> -> vector<8x24xf32>
    %272 = vector.extract_strided_slice %271 {offsets = [0, 0], sizes = [8, 22], strides = [1, 1]} : vector<8x24xf32> to vector<8x22xf32>
    %273 = vector.extract_strided_slice %271 {offsets = [0, 1], sizes = [8, 22], strides = [1, 1]} : vector<8x24xf32> to vector<8x22xf32>
    %274 = vector.extract_strided_slice %271 {offsets = [0, 2], sizes = [8, 22], strides = [1, 1]} : vector<8x24xf32> to vector<8x22xf32>
    %275 = tpu.concatenate %272, %273, %274 in 0 : vector<8x22xf32>, vector<8x22xf32>, vector<8x22xf32> -> vector<24x22xf32>
    %276 = vector.extract_strided_slice %246 {offsets = [0, 20], sizes = [8, 20], strides = [1, 1]} : vector<8x40xf32> to vector<8x20xf32>
    %277 = vector.broadcast %6 : f32 to vector<8x20xf32>
    %278 = arith.addf %276, %277 : vector<8x20xf32>
    %cst_93 = arith.constant dense<0.000000e+00> : vector<8xf32>
    %279 = vector.multi_reduction <add>, %278, %cst_93 [1] : vector<8x20xf32> to vector<8xf32>
    %280 = vector.shape_cast %279 : vector<8xf32> to vector<8x1xf32>
    %cst_94 = arith.constant 2.000000e+01 : f32
    %281 = vector.broadcast %cst_94 : f32 to vector<8x1xf32>
    %282 = arith.divf %280, %281 : vector<8x1xf32>
    %283 = vector.broadcast %282 : vector<8x1xf32> to vector<8x20xf32>
    %284 = arith.subf %278, %283 : vector<8x20xf32>
    %285 = arith.mulf %284, %284 : vector<8x20xf32>
    %cst_95 = arith.constant dense<0.000000e+00> : vector<8xf32>
    %286 = vector.multi_reduction <add>, %285, %cst_95 [1] : vector<8x20xf32> to vector<8xf32>
    %287 = vector.shape_cast %286 : vector<8xf32> to vector<8x1xf32>
    %cst_96 = arith.constant 2.000000e+01 : f32
    %288 = vector.broadcast %cst_96 : f32 to vector<8x1xf32>
    %289 = arith.divf %287, %288 : vector<8x1xf32>
    %cst_97 = arith.constant 9.99999974E-6 : f32
    %290 = vector.broadcast %cst_97 : f32 to vector<8x1xf32>
    %291 = arith.addf %289, %290 : vector<8x1xf32>
    %292 = math.rsqrt %291 : vector<8x1xf32>
    %293 = vector.broadcast %292 : vector<8x1xf32> to vector<8x20xf32>
    %294 = arith.mulf %284, %293 : vector<8x20xf32>
    %295 = tpu.concatenate %251, %294, %251 in 1 : vector<8x2xf32>, vector<8x20xf32>, vector<8x2xf32> -> vector<8x24xf32>
    %296 = vector.extract_strided_slice %295 {offsets = [0, 0], sizes = [8, 22], strides = [1, 1]} : vector<8x24xf32> to vector<8x22xf32>
    %297 = vector.extract_strided_slice %295 {offsets = [0, 1], sizes = [8, 22], strides = [1, 1]} : vector<8x24xf32> to vector<8x22xf32>
    %298 = vector.extract_strided_slice %295 {offsets = [0, 2], sizes = [8, 22], strides = [1, 1]} : vector<8x24xf32> to vector<8x22xf32>
    %299 = tpu.concatenate %296, %297, %298 in 0 : vector<8x22xf32>, vector<8x22xf32>, vector<8x22xf32> -> vector<24x22xf32>
    %300 = tpu.concatenate %275, %299 in 1 : vector<24x22xf32>, vector<24x22xf32> -> vector<24x44xf32>
    %cst_98 = arith.constant dense<0.000000e+00> : vector<8x44xf32>
    %301 = tpu.matmul %247, %300, %cst_98 {dimension_numbers = #tpu.dot_dimension_numbers<[1], [0], [0], [1], [0, 0, 1, 1], [], []>} : vector<8x24xf32>, vector<24x44xf32>, vector<8x44xf32> -> vector<8x44xf32>
    %302 = vector.broadcast %248 : vector<8x1xf32> to vector<8x44xf32>
    %303 = arith.addf %301, %302 : vector<8x44xf32>
    %cst_99 = arith.constant 0.000000e+00 : f32
    %304 = vector.broadcast %cst_99 : f32 to vector<8x44xf32>
    %305 = arith.cmpf oge, %303, %304 : vector<8x44xf32>
    %cst_100 = arith.constant 0.00999999977 : f32
    %306 = vector.broadcast %cst_100 : f32 to vector<8x44xf32>
    %307 = arith.mulf %306, %303 : vector<8x44xf32>
    %308 = arith.select %305, %303, %307 : vector<8x44xi1>, vector<8x44xf32>
    %cst_101 = arith.constant 0.000000e+00 : f32
    %309 = vector.broadcast %cst_101 : f32 to vector<8x1xf32>
    %310 = vector.extract_strided_slice %308 {offsets = [0, 0], sizes = [8, 22], strides = [1, 1]} : vector<8x44xf32> to vector<8x22xf32>
    %cst_102 = arith.constant dense<0.000000e+00> : vector<8xf32>
    %311 = vector.multi_reduction <add>, %310, %cst_102 [1] : vector<8x22xf32> to vector<8xf32>
    %312 = vector.shape_cast %311 : vector<8xf32> to vector<8x1xf32>
    %cst_103 = arith.constant 2.200000e+01 : f32
    %313 = vector.broadcast %cst_103 : f32 to vector<8x1xf32>
    %314 = arith.divf %312, %313 : vector<8x1xf32>
    %315 = vector.broadcast %314 : vector<8x1xf32> to vector<8x22xf32>
    %316 = arith.subf %310, %315 : vector<8x22xf32>
    %317 = arith.mulf %316, %316 : vector<8x22xf32>
    %cst_104 = arith.constant dense<0.000000e+00> : vector<8xf32>
    %318 = vector.multi_reduction <add>, %317, %cst_104 [1] : vector<8x22xf32> to vector<8xf32>
    %319 = vector.shape_cast %318 : vector<8xf32> to vector<8x1xf32>
    %cst_105 = arith.constant 2.200000e+01 : f32
    %320 = vector.broadcast %cst_105 : f32 to vector<8x1xf32>
    %321 = arith.divf %319, %320 : vector<8x1xf32>
    %cst_106 = arith.constant 9.99999974E-6 : f32
    %322 = vector.broadcast %cst_106 : f32 to vector<8x1xf32>
    %323 = arith.addf %321, %322 : vector<8x1xf32>
    %324 = math.rsqrt %323 : vector<8x1xf32>
    %325 = vector.broadcast %324 : vector<8x1xf32> to vector<8x22xf32>
    %326 = arith.mulf %316, %325 : vector<8x22xf32>
    %327 = tpu.concatenate %309, %326, %309 in 1 : vector<8x1xf32>, vector<8x22xf32>, vector<8x1xf32> -> vector<8x24xf32>
    %328 = vector.extract_strided_slice %327 {offsets = [0, 0], sizes = [8, 22], strides = [1, 1]} : vector<8x24xf32> to vector<8x22xf32>
    %329 = vector.extract_strided_slice %327 {offsets = [0, 1], sizes = [8, 22], strides = [1, 1]} : vector<8x24xf32> to vector<8x22xf32>
    %330 = vector.extract_strided_slice %327 {offsets = [0, 2], sizes = [8, 22], strides = [1, 1]} : vector<8x24xf32> to vector<8x22xf32>
    %331 = tpu.concatenate %328, %329, %330 in 0 : vector<8x22xf32>, vector<8x22xf32>, vector<8x22xf32> -> vector<24x22xf32>
    %332 = vector.extract_strided_slice %308 {offsets = [0, 22], sizes = [8, 22], strides = [1, 1]} : vector<8x44xf32> to vector<8x22xf32>
    %cst_107 = arith.constant dense<0.000000e+00> : vector<8xf32>
    %333 = vector.multi_reduction <add>, %332, %cst_107 [1] : vector<8x22xf32> to vector<8xf32>
    %334 = vector.shape_cast %333 : vector<8xf32> to vector<8x1xf32>
    %cst_108 = arith.constant 2.200000e+01 : f32
    %335 = vector.broadcast %cst_108 : f32 to vector<8x1xf32>
    %336 = arith.divf %334, %335 : vector<8x1xf32>
    %337 = vector.broadcast %336 : vector<8x1xf32> to vector<8x22xf32>
    %338 = arith.subf %332, %337 : vector<8x22xf32>
    %339 = arith.mulf %338, %338 : vector<8x22xf32>
    %cst_109 = arith.constant dense<0.000000e+00> : vector<8xf32>
    %340 = vector.multi_reduction <add>, %339, %cst_109 [1] : vector<8x22xf32> to vector<8xf32>
    %341 = vector.shape_cast %340 : vector<8xf32> to vector<8x1xf32>
    %cst_110 = arith.constant 2.200000e+01 : f32
    %342 = vector.broadcast %cst_110 : f32 to vector<8x1xf32>
    %343 = arith.divf %341, %342 : vector<8x1xf32>
    %cst_111 = arith.constant 9.99999974E-6 : f32
    %344 = vector.broadcast %cst_111 : f32 to vector<8x1xf32>
    %345 = arith.addf %343, %344 : vector<8x1xf32>
    %346 = math.rsqrt %345 : vector<8x1xf32>
    %347 = vector.broadcast %346 : vector<8x1xf32> to vector<8x22xf32>
    %348 = arith.mulf %338, %347 : vector<8x22xf32>
    %349 = tpu.concatenate %309, %348, %309 in 1 : vector<8x1xf32>, vector<8x22xf32>, vector<8x1xf32> -> vector<8x24xf32>
    %350 = vector.extract_strided_slice %349 {offsets = [0, 0], sizes = [8, 22], strides = [1, 1]} : vector<8x24xf32> to vector<8x22xf32>
    %351 = vector.extract_strided_slice %349 {offsets = [0, 1], sizes = [8, 22], strides = [1, 1]} : vector<8x24xf32> to vector<8x22xf32>
    %352 = vector.extract_strided_slice %349 {offsets = [0, 2], sizes = [8, 22], strides = [1, 1]} : vector<8x24xf32> to vector<8x22xf32>
    %353 = tpu.concatenate %350, %351, %352 in 0 : vector<8x22xf32>, vector<8x22xf32>, vector<8x22xf32> -> vector<24x22xf32>
    %354 = tpu.concatenate %331, %353 in 1 : vector<24x22xf32>, vector<24x22xf32> -> vector<24x44xf32>
    %cst_112 = arith.constant dense<0.000000e+00> : vector<8x44xf32>
    %355 = tpu.matmul %249, %354, %cst_112 {dimension_numbers = #tpu.dot_dimension_numbers<[1], [0], [0], [1], [0, 0, 1, 1], [], []>} : vector<8x24xf32>, vector<24x44xf32>, vector<8x44xf32> -> vector<8x44xf32>
    %356 = vector.broadcast %250 : vector<8x1xf32> to vector<8x44xf32>
    %357 = arith.addf %355, %356 : vector<8x44xf32>
    %cst_113 = arith.constant 0.000000e+00 : f32
    %358 = vector.broadcast %cst_113 : f32 to vector<8x44xf32>
    %359 = arith.cmpf oge, %357, %358 : vector<8x44xf32>
    %cst_114 = arith.constant 0.00999999977 : f32
    %360 = vector.broadcast %cst_114 : f32 to vector<8x44xf32>
    %361 = arith.mulf %360, %357 : vector<8x44xf32>
    %362 = arith.select %359, %357, %361 : vector<8x44xi1>, vector<8x44xf32>
    %c0_115 = arith.constant 0 : index
    %c0_116 = arith.constant 0 : index
    %c0_117 = arith.constant 0 : index
    %363 = vector.load %arg21[%c0_115, %c0_116, %c0_117] : memref<1x8x44xf32, #tpu.memory_space<vmem>>, vector<1x8x44xf32>
    %364 = vector.shape_cast %363 : vector<1x8x44xf32> to vector<8x44xf32>
    %365 = arith.addf %362, %364 : vector<8x44xf32>
    %c0_118 = arith.constant 0 : index
    %c0_119 = arith.constant 0 : index
    %366 = vector.load %arg15[%c0_118, %c0_119] : memref<4x24xf32, #tpu.memory_space<vmem>>, vector<4x24xf32>
    %c0_120 = arith.constant 0 : index
    %c0_121 = arith.constant 0 : index
    %367 = vector.load %arg16[%c0_120, %c0_121] : memref<4x1xf32, #tpu.memory_space<vmem>>, vector<4x1xf32>
    %c0_122 = arith.constant 0 : index
    %c0_123 = arith.constant 0 : index
    %368 = vector.load %arg17[%c0_122, %c0_123] : memref<4x12xf32, #tpu.memory_space<vmem>>, vector<4x12xf32>
    %c0_124 = arith.constant 0 : index
    %c0_125 = arith.constant 0 : index
    %369 = vector.load %arg18[%c0_124, %c0_125] : memref<4x1xf32, #tpu.memory_space<vmem>>, vector<4x1xf32>
    %cst_126 = arith.constant 0.000000e+00 : f32
    %370 = vector.broadcast %cst_126 : f32 to vector<8x2xf32>
    %371 = vector.extract_strided_slice %365 {offsets = [0, 0], sizes = [8, 22], strides = [1, 1]} : vector<8x44xf32> to vector<8x22xf32>
    %372 = vector.broadcast %3 : f32 to vector<8x22xf32>
    %373 = arith.addf %371, %372 : vector<8x22xf32>
    %cst_127 = arith.constant dense<0.000000e+00> : vector<8xf32>
    %374 = vector.multi_reduction <add>, %373, %cst_127 [1] : vector<8x22xf32> to vector<8xf32>
    %375 = vector.shape_cast %374 : vector<8xf32> to vector<8x1xf32>
    %cst_128 = arith.constant 2.200000e+01 : f32
    %376 = vector.broadcast %cst_128 : f32 to vector<8x1xf32>
    %377 = arith.divf %375, %376 : vector<8x1xf32>
    %378 = vector.broadcast %377 : vector<8x1xf32> to vector<8x22xf32>
    %379 = arith.subf %373, %378 : vector<8x22xf32>
    %380 = arith.mulf %379, %379 : vector<8x22xf32>
    %cst_129 = arith.constant dense<0.000000e+00> : vector<8xf32>
    %381 = vector.multi_reduction <add>, %380, %cst_129 [1] : vector<8x22xf32> to vector<8xf32>
    %382 = vector.shape_cast %381 : vector<8xf32> to vector<8x1xf32>
    %cst_130 = arith.constant 2.200000e+01 : f32
    %383 = vector.broadcast %cst_130 : f32 to vector<8x1xf32>
    %384 = arith.divf %382, %383 : vector<8x1xf32>
    %cst_131 = arith.constant 9.99999974E-6 : f32
    %385 = vector.broadcast %cst_131 : f32 to vector<8x1xf32>
    %386 = arith.addf %384, %385 : vector<8x1xf32>
    %387 = math.rsqrt %386 : vector<8x1xf32>
    %388 = vector.broadcast %387 : vector<8x1xf32> to vector<8x22xf32>
    %389 = arith.mulf %379, %388 : vector<8x22xf32>
    %390 = tpu.concatenate %370, %389, %370 in 1 : vector<8x2xf32>, vector<8x22xf32>, vector<8x2xf32> -> vector<8x26xf32>
    %391 = vector.extract_strided_slice %390 {offsets = [0, 0], sizes = [8, 24], strides = [1, 1]} : vector<8x26xf32> to vector<8x24xf32>
    %392 = vector.extract_strided_slice %390 {offsets = [0, 1], sizes = [8, 24], strides = [1, 1]} : vector<8x26xf32> to vector<8x24xf32>
    %393 = vector.extract_strided_slice %390 {offsets = [0, 2], sizes = [8, 24], strides = [1, 1]} : vector<8x26xf32> to vector<8x24xf32>
    %394 = tpu.concatenate %391, %392, %393 in 0 : vector<8x24xf32>, vector<8x24xf32>, vector<8x24xf32> -> vector<24x24xf32>
    %395 = vector.extract_strided_slice %365 {offsets = [0, 22], sizes = [8, 22], strides = [1, 1]} : vector<8x44xf32> to vector<8x22xf32>
    %396 = vector.broadcast %6 : f32 to vector<8x22xf32>
    %397 = arith.addf %395, %396 : vector<8x22xf32>
    %cst_132 = arith.constant dense<0.000000e+00> : vector<8xf32>
    %398 = vector.multi_reduction <add>, %397, %cst_132 [1] : vector<8x22xf32> to vector<8xf32>
    %399 = vector.shape_cast %398 : vector<8xf32> to vector<8x1xf32>
    %cst_133 = arith.constant 2.200000e+01 : f32
    %400 = vector.broadcast %cst_133 : f32 to vector<8x1xf32>
    %401 = arith.divf %399, %400 : vector<8x1xf32>
    %402 = vector.broadcast %401 : vector<8x1xf32> to vector<8x22xf32>
    %403 = arith.subf %397, %402 : vector<8x22xf32>
    %404 = arith.mulf %403, %403 : vector<8x22xf32>
    %cst_134 = arith.constant dense<0.000000e+00> : vector<8xf32>
    %405 = vector.multi_reduction <add>, %404, %cst_134 [1] : vector<8x22xf32> to vector<8xf32>
    %406 = vector.shape_cast %405 : vector<8xf32> to vector<8x1xf32>
    %cst_135 = arith.constant 2.200000e+01 : f32
    %407 = vector.broadcast %cst_135 : f32 to vector<8x1xf32>
    %408 = arith.divf %406, %407 : vector<8x1xf32>
    %cst_136 = arith.constant 9.99999974E-6 : f32
    %409 = vector.broadcast %cst_136 : f32 to vector<8x1xf32>
    %410 = arith.addf %408, %409 : vector<8x1xf32>
    %411 = math.rsqrt %410 : vector<8x1xf32>
    %412 = vector.broadcast %411 : vector<8x1xf32> to vector<8x22xf32>
    %413 = arith.mulf %403, %412 : vector<8x22xf32>
    %414 = tpu.concatenate %370, %413, %370 in 1 : vector<8x2xf32>, vector<8x22xf32>, vector<8x2xf32> -> vector<8x26xf32>
    %415 = vector.extract_strided_slice %414 {offsets = [0, 0], sizes = [8, 24], strides = [1, 1]} : vector<8x26xf32> to vector<8x24xf32>
    %416 = vector.extract_strided_slice %414 {offsets = [0, 1], sizes = [8, 24], strides = [1, 1]} : vector<8x26xf32> to vector<8x24xf32>
    %417 = vector.extract_strided_slice %414 {offsets = [0, 2], sizes = [8, 24], strides = [1, 1]} : vector<8x26xf32> to vector<8x24xf32>
    %418 = tpu.concatenate %415, %416, %417 in 0 : vector<8x24xf32>, vector<8x24xf32>, vector<8x24xf32> -> vector<24x24xf32>
    %419 = tpu.concatenate %394, %418 in 1 : vector<24x24xf32>, vector<24x24xf32> -> vector<24x48xf32>
    %cst_137 = arith.constant dense<0.000000e+00> : vector<4x48xf32>
    %420 = tpu.matmul %366, %419, %cst_137 {dimension_numbers = #tpu.dot_dimension_numbers<[1], [0], [0], [1], [0, 0, 1, 1], [], []>} : vector<4x24xf32>, vector<24x48xf32>, vector<4x48xf32> -> vector<4x48xf32>
    %421 = vector.broadcast %367 : vector<4x1xf32> to vector<4x48xf32>
    %422 = arith.addf %420, %421 : vector<4x48xf32>
    %cst_138 = arith.constant 0.000000e+00 : f32
    %423 = vector.broadcast %cst_138 : f32 to vector<4x48xf32>
    %424 = arith.cmpf oge, %422, %423 : vector<4x48xf32>
    %cst_139 = arith.constant 0.00999999977 : f32
    %425 = vector.broadcast %cst_139 : f32 to vector<4x48xf32>
    %426 = arith.mulf %425, %422 : vector<4x48xf32>
    %427 = arith.select %424, %422, %426 : vector<4x48xi1>, vector<4x48xf32>
    %cst_140 = arith.constant 0.000000e+00 : f32
    %428 = vector.broadcast %cst_140 : f32 to vector<4x1xf32>
    %429 = vector.extract_strided_slice %427 {offsets = [0, 0], sizes = [4, 24], strides = [1, 1]} : vector<4x48xf32> to vector<4x24xf32>
    %cst_141 = arith.constant dense<0.000000e+00> : vector<4xf32>
    %430 = vector.multi_reduction <add>, %429, %cst_141 [1] : vector<4x24xf32> to vector<4xf32>
    %431 = vector.shape_cast %430 : vector<4xf32> to vector<4x1xf32>
    %cst_142 = arith.constant 2.400000e+01 : f32
    %432 = vector.broadcast %cst_142 : f32 to vector<4x1xf32>
    %433 = arith.divf %431, %432 : vector<4x1xf32>
    %434 = vector.broadcast %433 : vector<4x1xf32> to vector<4x24xf32>
    %435 = arith.subf %429, %434 : vector<4x24xf32>
    %436 = arith.mulf %435, %435 : vector<4x24xf32>
    %cst_143 = arith.constant dense<0.000000e+00> : vector<4xf32>
    %437 = vector.multi_reduction <add>, %436, %cst_143 [1] : vector<4x24xf32> to vector<4xf32>
    %438 = vector.shape_cast %437 : vector<4xf32> to vector<4x1xf32>
    %cst_144 = arith.constant 2.400000e+01 : f32
    %439 = vector.broadcast %cst_144 : f32 to vector<4x1xf32>
    %440 = arith.divf %438, %439 : vector<4x1xf32>
    %cst_145 = arith.constant 9.99999974E-6 : f32
    %441 = vector.broadcast %cst_145 : f32 to vector<4x1xf32>
    %442 = arith.addf %440, %441 : vector<4x1xf32>
    %443 = math.rsqrt %442 : vector<4x1xf32>
    %444 = vector.broadcast %443 : vector<4x1xf32> to vector<4x24xf32>
    %445 = arith.mulf %435, %444 : vector<4x24xf32>
    %446 = tpu.concatenate %428, %445, %428 in 1 : vector<4x1xf32>, vector<4x24xf32>, vector<4x1xf32> -> vector<4x26xf32>
    %447 = vector.extract_strided_slice %446 {offsets = [0, 0], sizes = [4, 24], strides = [1, 1]} : vector<4x26xf32> to vector<4x24xf32>
    %448 = vector.extract_strided_slice %446 {offsets = [0, 1], sizes = [4, 24], strides = [1, 1]} : vector<4x26xf32> to vector<4x24xf32>
    %449 = vector.extract_strided_slice %446 {offsets = [0, 2], sizes = [4, 24], strides = [1, 1]} : vector<4x26xf32> to vector<4x24xf32>
    %450 = tpu.concatenate %447, %448, %449 in 0 : vector<4x24xf32>, vector<4x24xf32>, vector<4x24xf32> -> vector<12x24xf32>
    %451 = vector.extract_strided_slice %427 {offsets = [0, 24], sizes = [4, 24], strides = [1, 1]} : vector<4x48xf32> to vector<4x24xf32>
    %cst_146 = arith.constant dense<0.000000e+00> : vector<4xf32>
    %452 = vector.multi_reduction <add>, %451, %cst_146 [1] : vector<4x24xf32> to vector<4xf32>
    %453 = vector.shape_cast %452 : vector<4xf32> to vector<4x1xf32>
    %cst_147 = arith.constant 2.400000e+01 : f32
    %454 = vector.broadcast %cst_147 : f32 to vector<4x1xf32>
    %455 = arith.divf %453, %454 : vector<4x1xf32>
    %456 = vector.broadcast %455 : vector<4x1xf32> to vector<4x24xf32>
    %457 = arith.subf %451, %456 : vector<4x24xf32>
    %458 = arith.mulf %457, %457 : vector<4x24xf32>
    %cst_148 = arith.constant dense<0.000000e+00> : vector<4xf32>
    %459 = vector.multi_reduction <add>, %458, %cst_148 [1] : vector<4x24xf32> to vector<4xf32>
    %460 = vector.shape_cast %459 : vector<4xf32> to vector<4x1xf32>
    %cst_149 = arith.constant 2.400000e+01 : f32
    %461 = vector.broadcast %cst_149 : f32 to vector<4x1xf32>
    %462 = arith.divf %460, %461 : vector<4x1xf32>
    %cst_150 = arith.constant 9.99999974E-6 : f32
    %463 = vector.broadcast %cst_150 : f32 to vector<4x1xf32>
    %464 = arith.addf %462, %463 : vector<4x1xf32>
    %465 = math.rsqrt %464 : vector<4x1xf32>
    %466 = vector.broadcast %465 : vector<4x1xf32> to vector<4x24xf32>
    %467 = arith.mulf %457, %466 : vector<4x24xf32>
    %468 = tpu.concatenate %428, %467, %428 in 1 : vector<4x1xf32>, vector<4x24xf32>, vector<4x1xf32> -> vector<4x26xf32>
    %469 = vector.extract_strided_slice %468 {offsets = [0, 0], sizes = [4, 24], strides = [1, 1]} : vector<4x26xf32> to vector<4x24xf32>
    %470 = vector.extract_strided_slice %468 {offsets = [0, 1], sizes = [4, 24], strides = [1, 1]} : vector<4x26xf32> to vector<4x24xf32>
    %471 = vector.extract_strided_slice %468 {offsets = [0, 2], sizes = [4, 24], strides = [1, 1]} : vector<4x26xf32> to vector<4x24xf32>
    %472 = tpu.concatenate %469, %470, %471 in 0 : vector<4x24xf32>, vector<4x24xf32>, vector<4x24xf32> -> vector<12x24xf32>
    %473 = tpu.concatenate %450, %472 in 1 : vector<12x24xf32>, vector<12x24xf32> -> vector<12x48xf32>
    %cst_151 = arith.constant dense<0.000000e+00> : vector<4x48xf32>
    %474 = tpu.matmul %368, %473, %cst_151 {dimension_numbers = #tpu.dot_dimension_numbers<[1], [0], [0], [1], [0, 0, 1, 1], [], []>} : vector<4x12xf32>, vector<12x48xf32>, vector<4x48xf32> -> vector<4x48xf32>
    %475 = vector.broadcast %369 : vector<4x1xf32> to vector<4x48xf32>
    %476 = arith.addf %474, %475 : vector<4x48xf32>
    %c0_152 = arith.constant 0 : index
    %c0_153 = arith.constant 0 : index
    %c0_154 = arith.constant 0 : index
    %477 = vector.load %arg22[%c0_152, %c0_153, %c0_154] : memref<1x4x48xf32, #tpu.memory_space<vmem>>, vector<1x4x48xf32>
    %478 = vector.shape_cast %477 : vector<1x4x48xf32> to vector<4x48xf32>
    %479 = vector.shape_cast %476 : vector<4x48xf32> to vector<1x4x48xf32>
    tpu.vector_store %arg22[%c0_152, %c0_153, %c0_154], %479 {strides = array<i32>} : memref<1x4x48xf32, #tpu.memory_space<vmem>>, vector<1x4x48xf32>,
    return
  }
  func.func @transform_0(%arg0: i32) -> (i32, i32, i32) {
    %c0_i32 = arith.constant 0 : i32
    %c0_i32_0 = arith.constant 0 : i32
    %c0_i32_1 = arith.constant 0 : i32
    return %arg0, %c0_i32, %c0_i32_0 : i32, i32, i32
  }
  func.func @transform_1(%arg0: i32) -> i32 {
    %c0_i32 = arith.constant 0 : i32
    %c0_i32_0 = arith.constant 0 : i32
    return %c0_i32 : i32
  }
  func.func @transform_2(%arg0: i32) -> (i32, i32) {
    %c0_i32 = arith.constant 0 : i32
    %c0_i32_0 = arith.constant 0 : i32
    %c0_i32_1 = arith.constant 0 : i32
    return %c0_i32, %c0_i32_0 : i32, i32
  }
  func.func @transform_3(%arg0: i32) -> (i32, i32) {
    %c0_i32 = arith.constant 0 : i32
    %c0_i32_0 = arith.constant 0 : i32
    %c0_i32_1 = arith.constant 0 : i32
    return %c0_i32, %c0_i32_0 : i32, i32
  }
  func.func @transform_4(%arg0: i32) -> (i32, i32) {
    %c0_i32 = arith.constant 0 : i32
    %c0_i32_0 = arith.constant 0 : i32
    %c0_i32_1 = arith.constant 0 : i32
    return %c0_i32, %c0_i32_0 : i32, i32
  }
  func.func @transform_5(%arg0: i32) -> (i32, i32) {
    %c0_i32 = arith.constant 0 : i32
    %c0_i32_0 = arith.constant 0 : i32
    %c0_i32_1 = arith.constant 0 : i32
    return %c0_i32, %c0_i32_0 : i32, i32
  }
  func.func @transform_6(%arg0: i32) -> (i32, i32) {
    %c0_i32 = arith.constant 0 : i32
    %c0_i32_0 = arith.constant 0 : i32
    %c0_i32_1 = arith.constant 0 : i32
    return %c0_i32, %c0_i32_0 : i32, i32
  }
  func.func @transform_7(%arg0: i32) -> (i32, i32) {
    %c0_i32 = arith.constant 0 : i32
    %c0_i32_0 = arith.constant 0 : i32
    %c0_i32_1 = arith.constant 0 : i32
    return %c0_i32, %c0_i32_0 : i32, i32
  }
  func.func @transform_8(%arg0: i32) -> (i32, i32) {
    %c0_i32 = arith.constant 0 : i32
    %c0_i32_0 = arith.constant 0 : i32
    %c0_i32_1 = arith.constant 0 : i32
    return %c0_i32, %c0_i32_0 : i32, i32
  }
  func.func @transform_9(%arg0: i32) -> (i32, i32) {
    %c0_i32 = arith.constant 0 : i32
    %c0_i32_0 = arith.constant 0 : i32
    %c0_i32_1 = arith.constant 0 : i32
    return %c0_i32, %c0_i32_0 : i32, i32
  }
  func.func @transform_10(%arg0: i32) -> (i32, i32) {
    %c0_i32 = arith.constant 0 : i32
    %c0_i32_0 = arith.constant 0 : i32
    %c0_i32_1 = arith.constant 0 : i32
    return %c0_i32, %c0_i32_0 : i32, i32
  }
  func.func @transform_11(%arg0: i32) -> (i32, i32) {
    %c0_i32 = arith.constant 0 : i32
    %c0_i32_0 = arith.constant 0 : i32
    %c0_i32_1 = arith.constant 0 : i32
    return %c0_i32, %c0_i32_0 : i32, i32
  }
  func.func @transform_12(%arg0: i32) -> (i32, i32) {
    %c0_i32 = arith.constant 0 : i32
    %c0_i32_0 = arith.constant 0 : i32
    %c0_i32_1 = arith.constant 0 : i32
    return %c0_i32, %c0_i32_0 : i32, i32
  }
  func.func @transform_13(%arg0: i32) -> (i32, i32) {
    %c0_i32 = arith.constant 0 : i32
    %c0_i32_0 = arith.constant 0 : i32
    %c0_i32_1 = arith.constant 0 : i32
    return %c0_i32, %c0_i32_0 : i32, i32
  }
  func.func @transform_14(%arg0: i32) -> (i32, i32) {
    %c0_i32 = arith.constant 0 : i32
    %c0_i32_0 = arith.constant 0 : i32
    %c0_i32_1 = arith.constant 0 : i32
    return %c0_i32, %c0_i32_0 : i32, i32
  }
  func.func @transform_15(%arg0: i32) -> (i32, i32) {
    %c0_i32 = arith.constant 0 : i32
    %c0_i32_0 = arith.constant 0 : i32
    %c0_i32_1 = arith.constant 0 : i32
    return %c0_i32, %c0_i32_0 : i32, i32
  }
  func.func @transform_16(%arg0: i32) -> (i32, i32) {
    %c0_i32 = arith.constant 0 : i32
    %c0_i32_0 = arith.constant 0 : i32
    %c0_i32_1 = arith.constant 0 : i32
    return %c0_i32, %c0_i32_0 : i32, i32
  }
  func.func @transform_17(%arg0: i32) -> (i32, i32) {
    %c0_i32 = arith.constant 0 : i32
    %c0_i32_0 = arith.constant 0 : i32
    %c0_i32_1 = arith.constant 0 : i32
    return %c0_i32, %c0_i32_0 : i32, i32
  }
  func.func @transform_18(%arg0: i32) -> (i32, i32, i32) {
    %c0_i32 = arith.constant 0 : i32
    %c0_i32_0 = arith.constant 0 : i32
    %c0_i32_1 = arith.constant 0 : i32
    return %arg0, %c0_i32, %c0_i32_0 : i32, i32, i32
  }
  func.func @transform_19(%arg0: i32) -> (i32, i32, i32) {
    %c0_i32 = arith.constant 0 : i32
    %c0_i32_0 = arith.constant 0 : i32
    %c0_i32_1 = arith.constant 0 : i32
    return %arg0, %c0_i32, %c0_i32_0 : i32, i32, i32
  }
  func.func @transform_20(%arg0: i32) -> (i32, i32, i32) {
    %c0_i32 = arith.constant 0 : i32
    %c0_i32_0 = arith.constant 0 : i32
    %c0_i32_1 = arith.constant 0 : i32
    return %arg0, %c0_i32, %c0_i32_0 : i32, i32, i32
  }
  func.func @transform_21(%arg0: i32) -> (i32, i32, i32) {
    %c0_i32 = arith.constant 0 : i32
    %c0_i32_0 = arith.constant 0 : i32
    %c0_i32_1 = arith.constant 0 : i32
    return %arg0, %c0_i32, %c0_i32_0 : i32, i32, i32
  }
}

</mosaic_0001>

<bundles_post_ra>
// kernel: tpu_custom_call.1
= control target key start
LH: loop header
LB: loop body
LE: loop exit
PB: predicated region body
PF: predicated region fallthrough
CT: control target
= control target key end

     0   :  { %s3023_s0 = inlined_call_operand.vmem [shape: f32[2,4,32], index: 0, kind: input, shape index: {}]   ;;  %s3024_s1 = inlined_call_operand.vmem [shape: f32[4], index: 1, kind: input, shape index: {}]   ;;  %s3025_s2 = inlined_call_operand.vmem [shape: f32[8,12], index: 2, kind: input, shape index: {}]   ;;  %s3026_s3 = inlined_call_operand.vmem [shape: f32[8,1], index: 3, kind: input, shape index: {}]   ;;  %s3027_s4 = inlined_call_operand.vmem [shape: f32[8,24], index: 4, kind: input, shape index: {}]   ;;  %s3028_s5 = inlined_call_operand.vmem [shape: f32[8,1], index: 5, kind: input, shape index: {}]   ;;  %s3029_s6 = inlined_call_operand.vmem [shape: f32[8,24], index: 6, kind: input, shape index: {}]   ;;  %s3030_s7 = inlined_call_operand.vmem [shape: f32[8,1], index: 7, kind: input, shape index: {}]   ;;  %s3031_s8 = inlined_call_operand.vmem [shape: f32[8,24], index: 8, kind: input, shape index: {}]   ;;  %s3032_s9 = inlined_call_operand.vmem [shape: f32[8,1], index: 9, kind: input, shape index: {}]   ;;  %s3033_s10 = inlined_call_operand.vmem [shape: f32[8,24], index: 10, kind: input, shape index: {}]   ;;  %s3034_s11 = inlined_call_operand.vmem [shape: f32[8,1], index: 11, kind: input, shape index: {}]   ;;  %s3035_s12 = inlined_call_operand.vmem [shape: f32[8,24], index: 12, kind: input, shape index: {}]   ;;  %s3036_s13 = inlined_call_operand.vmem [shape: f32[8,1], index: 13, kind: input, shape index: {}]   ;;  %s3037_s14 = inlined_call_operand.vmem [shape: f32[4,24], index: 14, kind: input, shape index: {}]   ;;  %s3038_s15 = inlined_call_operand.vmem [shape: f32[4,1], index: 15, kind: input, shape index: {}]   ;;  %s3039_s16 = inlined_call_operand.vmem [shape: f32[4,12], index: 16, kind: input, shape index: {}]   ;;  %s3040_s17 = inlined_call_operand.vmem [shape: f32[4,1], index: 17, kind: input, shape index: {}]   ;;  %s3041_s18 = inlined_call_operand.vmem [shape: f32[2,8,36], index: 18, kind: input, shape index: {}]   ;;  %s3042_s19 = inlined_call_operand.vmem [shape: f32[2,8,40], index: 19, kind: input, shape index: {}]   ;;  %s3043_s20 = inlined_call_operand.vmem [shape: f32[2,8,44], index: 20, kind: input, shape index: {}]   ;;  %s3044_s21 = inlined_call_operand.hbm [shape: f32[2,4,48], index: 21, kind: output, shape index: {}]  }
   0x1   :  { %3061 = sst [smem:[#allocation12_spill]] %s3023_s0 }
   0x2   :  { %3062 = sst [smem:[#allocation13_spill]] %s3024_s1 }
   0x3   :  { %3063 = sst [smem:[#allocation14_spill]] %s3025_s2 }
   0x4   :  { %3064 = sst [smem:[#allocation15_spill]] %s3026_s3 }
   0x5   :  { %3065 = sst [smem:[#allocation16_spill]] %s3027_s4 }
   0x6   :  { %3066 = sst [smem:[#allocation17_spill]] %s3028_s5 }
   0x7   :  { %3067 = sst [smem:[#allocation18_spill]] %s3029_s6 }
   0x8   :  { %26 = vsyncpa [#allocation4], 0 }
   0x9   :  { %27 = vsyncpa [#allocation3], 0 }
   0xa   :  { %29 = vsyncpa [#allocation3 + $0x1], 0  ;;  %s2626_s2 = smov 0   ;;  %s2628_s25 = smov 0  }
   0xb   :  { %s2630_s26 = smov 0   ;;  %s2632_s27 = smov 0  }
   0xc LB: > { %3068 = sst [smem:[#allocation8_spill]] %s2485_s26  ;;  %s2647_s3 = sadd.s32 4294967295, %s2489_s27   ;;  %s2489_s27 = sphi %s2632_s27, %s3092_s27   ;;  %s2485_s26 = sphi %s2630_s26, %s3094_s26   ;;  %s2481_s25 = sphi %s2628_s25, %s3096_s25   ;;  %s2477_s2 = sphi %s2626_s2, %s3095_s2  }
   0xd   : > { %s2111_s28 = sadd.s32 4294967294, %s2489_s27   ;;  %s2651_s29 = sadd.s32 1, %s2489_s27  }
   0xe   : > { %3069 = sst [smem:[#allocation9_spill]] %s2651_s29  ;;  %s503_s0 = sadd.s32 1, %s2485_s26 }
   0xf   : > { %s500_s4 = ssub.s32 %s2489_s27, %s2651_s29  ;;  %p513_p0 = scmp.ne.s32.totalorder %s2485_s26, %s2481_s25 }
  0x10   : > { %p501_p1 = scmp.eq.s32.totalorder %s500_s4, 0  ;;  %p514_p2 = scmp.eq.s32.totalorder %s2647_s3, 1 }
  0x11   : > { %p519_p3 = scmp.ne.s32.totalorder %s2481_s25, %s2477_s2  ;;  %p520_p4 = scmp.eq.s32.totalorder %s2111_s28, 1 }
  0x12   : > { %s2662_s30 = scalar_select %p501_p1, %s2485_s26, %s503_s0  }
  0x13   : > { %p2664_p5 = por %p514_p2, %p513_p0  ;;  %p2668_p6 = por %p520_p4, %p519_p3 }
  0x14   : > { %3070 = sst [smem:[#allocation10_spill]] %s2662_s30  ;;  %p2112_p7 = scmp.ge.s32.totalorder %s2489_s27, 1 }
  0x15   : > { %s3072_s22 = scalar_select %p2668_p6, 1, 0 }
  0x16   : > { %p527_p8 = scmp.lt.s32.totalorder %s2489_s27, 3  ;;  %p2275_p9 = scmp.eq.s32.totalorder %s2647_s3, 0 }
  0x17   : > { %3073 = sst [smem:[#allocation11_spill]] %s3072_s22  ;;  %s3075_s28 = sld [smem:[#allocation13_spill]] }
  0x18   : > { %p2675_p10 = pnand %p2112_p7, %p527_p8 }
  0x1a   : > { %p2267_p11 = pneg %p2675_p10 }
  0x1c   : > { %p2268_p12 = pnand %p2275_p9, %p2267_p11 }
  0x1d   : > { %s540_s0 = sshll.u32 %s3075_s28, 4  ;;  %s541_s0 = int_to_ptr.vmem [resolvable:$true] %s540_s0 }
  0x1e   : > { %s2408_s4 = scalar_lea.vmem %s541_s0, 16  ;;  %p2410_p0 = pneg %p2268_p12 }
  0x1f   : > { %p2409_p13 = scmp.ne.s32.totalorder %s541_s0, %s2408_s4  ;;  %p2416_p3 = scmp.lt.s32.totalorder %s541_s0, %s541_s0 }
  0x20   : > { %p2417_p4 = scmp.lt.s32.totalorder %s2408_s4, %s2408_s4 }
  0x21   : > { %p2411_p1 = pnand %p2410_p0, %p2409_p13 }
  0x22   : > { %p2418_p7 = por %p2417_p4, %p2416_p3 }
  0x23   : > { %p2412_p2 = pneg %p2411_p1 }
  0x25   : > { %p2419_p8 = pnand %p2418_p7, %p2412_p2 }
  0x27   : > { %2422 = shalt.err (!%p2419_p8)
}
  0x28   : > { %s2491_s30 = smov [#allocation2]   ;;  %629 = sbr.rel (%p2675_p10) target bundleno = 9010 (0x2332), region = 104 }
  0x29   : > { %2270 = dma.vmem_to_smem (!%p2268_p12), %s541_s0, 16, %s2491_s30, [#allocation4]  }
  0x2f   : > { %2468 = dma.done.wait (%p2275_p9), [#allocation4], 16  }
  0x30   : > { %2470 = vsyncadd (%p2275_p9), [#allocation4], 4294967280 }
  0x31   : > { %635 = sfence }
  0x32   : > { %p701_p11 = scmp.lt.s32.totalorder %s2647_s3, 1  ;;  %s2122_s1 = sshll.u32 %s2647_s3, 1  ;;  %vm728_vm0 = vcmask 125952   ;;  %vm747_vm1 = vcmask 15360   ;;  %vm749_vm2 = vcmask 146432   ;;  %v2497_v37 = vmov 0.0|0.0  }
  0x33   : > { %s719_s24 = sadd.s32 1, %s2122_s1  ;;  %s3076_s26 = sld [smem:[#allocation12_spill]]  ;;  %2235 = vmatprep.subr.bf16.mxu0 %v2497_v37  ;;  %2239 = vmatprep.subr.bf16.mxu1 %v2497_v37  ;;  %vm2498_vm3 = vmmov 0   ;;  %v2499_v39 = vmov 0.0   ;;  %vm759_vm4 = vcmask 1043456   ;;  %v2500_v41 = vmov 0  }
  0x34   : > { %s2695_s28 = scalar_select %p701_p11, %s2647_s3, 1  ;;  %2171 = vmatprep.mubr.msk.f32.mxu0 %vm2498_vm3, %v2499_v39  ;;  %2180 = vmatprep.mubr.msk.f32.mxu1 %vm2498_vm3, %v2499_v39  ;;  %vm2502_vm5 = vmmov 1   ;;  %vm812_vm7 = vcmask 97280   ;;  %vm910_vm9 = vcmask 7168   ;;  %vm912_vm10 = vcmask 154624  }
  0x35   : > { %s720_s30 = sld [smem:[#allocation2 + %s719_s24]]  ;;  %s2492_s22 = smov 112   ;;  %2339 = vset.pattern.permute.xlu1 %v2500_v41  ;;  %2345 = vset.pattern.permute.xlu0 %v2500_v41  ;;  %vm2737_vm6 = vmpackc.low %vm759_vm4, %vm2502_vm5  ;;  %vm970_vm11 = vcmask 195584   ;;  %vm1072_vm13 = vcmask 162816   ;;  %vm1226_vm15 = vcmask 171008  }
  0x36   : > { %s2118_s0 = sshll.u32 %s2695_s28, 2  ;;  %s3053_s24 = smov 127  }
  0x37   : > { %s3077_s4 = sld [smem:[#allocation15_spill]]  ;;  %s3080_s23 = sld [smem:[#allocation14_spill]] }
  0x38   : > { %s3085_s6 = sld [smem:[#allocation18_spill]] }
  0x39   : > { %s704_s29 = scalar_lea.vmem %s3076_s26, %s2118_s0  ;;  %s718_s26 = sld [smem:[#allocation2 + %s2122_s1]] }
  0x3a   : > { %v721_v0 = vld [vmem:[%s704_s29] sm:$0xf]  ;;  %s2493_s29 = smov 114   ;;  %s3055_s1 = smov 2  }
  0x3b   : > { %v2701_v1 = vstv %s720_s30  ;;  %s3051_s30 = smov 126   ;;  %s3049_s0 = smov 1  }
  0x3c   : > { %v762_v2 = vadd.f32 %v2701_v1, %v721_v0 }
  0x3d   : > { %v723_v40 = vld [vmem:[%s3077_s4] sm:$0xff]  ;;  %s3057_s4 = smov 110  }
  0x3e   : > { %764 = vrot.lane.b32.xlu0 %v762_v2, %s2492_s22  ;;  %v722_v55 = vld [vmem:[%s3080_s23] sm:$0xff]  ;;  %s2506_s23 = smov 20  }
  0x3f   : > { %v2707_v9 = vstv %s718_s26  ;;  %s2501_s26 = smov 18  }
  0x40   : > { %v727_v10 = vadd.f32 %v2707_v9, %v721_v0 }
  0x42   : > { %v729_v11 = vsel %vm728_vm0, %v727_v10, 0.0 }
  0xb0   : > { %v765_v3 = vpop.permute.xlu0 %764 }
  0xb1   : > { %v767_v4 = vsel %vm728_vm0, %v765_v3, 0.0 }
  0xb2   : > { %768 = vadd.xlane.f32.xlu0 %v767_v4 }
 0x13f   : > { %v769_v5 = vpop.xlane.xlu0 %768 }
 0x140   : > { %v770_v6 = vmul.f32 0.0625, %v769_v5 }
 0x142   : > { %v771_v7 = vsub.f32 %v762_v2, %v770_v6 }
 0x144   : > { %v772_v8 = vmul.f32 %v771_v7, %v771_v7 }
 0x146   : > { %774 = vrot.lane.b32.xlu1 %v772_v8, %s2492_s22 }
 0x16a   : > { %730 = vadd.xlane.f32.xlu1 %v729_v11 }
 0x1b8   : > { %v775_v12 = vpop.permute.xlu1 %774 }
 0x1b9   : > { %v777_v13 = vsel %vm728_vm0, %v775_v12, 0.0 }
 0x1ba   : > { %778 = vadd.xlane.f32.xlu0 %v777_v13 }
 0x1f7   : > { %v731_v14 = vpop.xlane.xlu1 %730 }
 0x1f8   : > { %v733_v15 = vmul.f32 0.0625, %v731_v14 }
 0x1fa   : > { %v734_v16 = vsub.f32 %v727_v10, %v733_v15 }
 0x1fc   : > { %v735_v17 = vmul.f32 %v734_v16, %v734_v16 }
 0x1fe   : > { %v736_v18 = vsel %vm728_vm0, %v735_v17, 0.0 }
 0x1ff   : > { %737 = vadd.xlane.f32.xlu0 %v736_v18 }
 0x247   : > { %v779_v19 = vpop.xlane.xlu0 %778 }
 0x248   : > { %v780_v20 = vmul.f32 0.0625, %v779_v19 }
 0x24a   : > { %v781_v21 = vadd.f32 1e-05, %v780_v20 }
 0x24c   : > { %2376 = vrsqrt.f32 %v781_v21 }
 0x256   : > { %v2377_v22 = vpop.eup %2376 }
 0x257   : > { %v783_v23 = vmul.f32 %v2377_v22, %v771_v7 }
 0x259   : > { %785 = vrot.lane.b32.xlu1 %v783_v23, %s2493_s29  ;;  %s2504_s29 = smov 111  }
 0x28c   : > { %v738_v24 = vpop.xlane.xlu0 %737 }
 0x28d   : > { %v739_v25 = vmul.f32 0.0625, %v738_v24 }
 0x28f   : > { %v740_v26 = vadd.f32 1e-05, %v739_v25 }
 0x291   : > { %2378 = vrsqrt.f32 %v740_v26 }
 0x29b   : > { %v2379_v27 = vpop.eup %2378 }
 0x29c   : > { %v742_v28 = vmul.f32 %v2379_v27, %v734_v16 }
 0x29e   : > { %744 = vrot.lane.b32.xlu0 %v742_v28, %s3055_s1 }
 0x2cb   : > { %v786_v29 = vpop.permute.xlu1 %785 }
 0x2cc   : > { %v788_v30 = vsel %vm747_vm1, 0.0, %v786_v29 }
 0x2cd   : > { %v789_v31 = vsel %vm749_vm2, %v788_v30, 0.0 }
 0x2ce   : > { %v791_v32 = vrot.slane %v789_v31, 4 }
 0x2d0   : > { %792 = vrot.lane.b32.xlu1 %v791_v32, %s3053_s24 }
 0x2d4   : > { %795 = vrot.lane.b32.xlu1 %v789_v31, %s3051_s30 }
 0x310   : > { %v745_v33 = vpop.permute.xlu0 %744 }
 0x311   : > { %v748_v34 = vsel %vm747_vm1, 0.0, %v745_v33 }
 0x312   : > { %v750_v35 = vsel %vm749_vm2, %v748_v34, 0.0 }
 0x313   : > { %756 = vrot.lane.b32.xlu1 %v750_v35, %s3051_s30  ;;  %v752_v36 = vrot.slane %v750_v35, 4 }
 0x315   : > { %753 = vrot.lane.b32.xlu0 %v752_v36, %s3053_s24 }
 0x317   : > { %809 = vperm.xlu1 %2339, %v723_v40  }
 0x342   : > { %v793_v38 = vpop.permute.xlu1 %792 }
 0x343   : > { %v797_v42 = vsel %vm759_vm4, %v789_v31, %v793_v38 }
 0x346   : > { %v796_v43 = vpop.permute.xlu1 %795 }
 0x347   : > { %v2334_v44 = vpack.i.bf16 %v796_v43, %v797_v42 }
 0x349   : > { %2335 = vrot.lane.b32.xlu0 %v2334_v44, %s2501_s26 }
 0x385   : > { %v757_v49 = vpop.permute.xlu1 %756 }
 0x387   : > { %v754_v45 = vpop.permute.xlu0 %753 }
 0x388   : > { %v760_v50 = vsel %vm759_vm4, %v750_v35, %v754_v45 }
 0x396   : > { %v810_v56 = vpop.permute.xlu1 %809 }
 0x3bb   : > { %v2336_v46 = vpop.permute.xlu0 %2335 }
 0x3bc   : > { %v2338_v47 = vunpack.i.h.bf16 %v2336_v46  ;;  %v2337_v48 = vunpack.i.l.bf16 %v2336_v46 }
 0x3be   : > { %v805_v51 = vsel %vm749_vm2, %v760_v50, %v2337_v48  ;;  %v806_v52 = vsel %vm749_vm2, %v757_v49, %v2338_v47 }
 0x3bf   : > { %v2236_v54 = vpack.c.bf16 %v806_v52, %v805_v51 }
 0x3c1   : > { %2238 = vmatpush3.bf16.msk.msra.mxu0 %vm2737_vm6, %v2236_v54 }
 0x3c2   : > { %2242 = vmatprep.subr.bf16.mxu0 %v2497_v37 }
 0x3c4   : > { %2172 = vmatmul.mubr.msk.f32.vlgmr.msra.gmra.mrb[0].mxu0 %vm812_vm7, %v722_v55 }
 0x3c5   : > { %2189 = vmatprep.mubr.msk.f32.mxu0 %vm2498_vm3, %v2499_v39 }
 0x497   : > { %v885_v57 = vpop.f32.mrb[0].mxu0 }
 0x498   : > { %v886_v58 = vadd.f32 %v885_v57, %v810_v56  ;;  %v2173_v59 = vpop.f32.mrb[1].mxu0 }
 0x49a   : > { %v890_v60 = vmul.f32 0.01, %v886_v58  ;;  %vm889_vm8 = vcmp.ge.f32.partialorder %v886_v58, 0.0 }
 0x49c   : > { %v891_v61 = vsel %vm889_vm8, %v886_v58, %v890_v60  ;;  %vm1539_vm8 = vcmask 187392  }
 0x49d   : > { %922 = vrot.lane.b32.xlu0 %v891_v61, %s3057_s4  ;;  %v892_v5 = vsel %vm749_vm2, %v891_v61, 0.0 }
 0x50f   : > { %v923_v62 = vpop.permute.xlu0 %922 }
 0x510   : > { %v925_v63 = vsel %vm749_vm2, %v923_v62, 0.0 }
 0x511   : > { %926 = vadd.xlane.f32.xlu1 %v925_v63 }
 0x59e   : > { %v927_v0 = vpop.xlane.xlu1 %926 }
 0x59f   : > { %v928_v2 = vmul.f32 0.055555556, %v927_v0 }
 0x5a1   : > { %v929_v3 = vsub.f32 %v891_v61, %v928_v2 }
 0x5a3   : > { %v930_v4 = vmul.f32 %v929_v3, %v929_v3 }
 0x5a5   : > { %932 = vrot.lane.b32.xlu0 %v930_v4, %s3057_s4 }
 0x5c4   : > { %893 = vadd.xlane.f32.xlu0 %v892_v5 }
 0x617   : > { %v933_v6 = vpop.permute.xlu0 %932 }
 0x618   : > { %v935_v7 = vsel %vm749_vm2, %v933_v6, 0.0 }
 0x619   : > { %936 = vadd.xlane.f32.xlu1 %v935_v7 }
 0x651   : > { %v894_v8 = vpop.xlane.xlu0 %893 }
 0x652   : > { %v896_v10 = vmul.f32 0.055555556, %v894_v8 }
 0x654   : > { %v897_v11 = vsub.f32 %v891_v61, %v896_v10 }
 0x656   : > { %v898_v12 = vmul.f32 %v897_v11, %v897_v11 }
 0x658   : > { %v899_v13 = vsel %vm749_vm2, %v898_v12, 0.0 }
 0x659   : > { %900 = vadd.xlane.f32.xlu0 %v899_v13 }
 0x6a6   : > { %v937_v14 = vpop.xlane.xlu1 %936 }
 0x6a7   : > { %v938_v15 = vmul.f32 0.055555556, %v937_v14 }
 0x6a9   : > { %v939_v16 = vadd.f32 1e-05, %v938_v15 }
 0x6ab   : > { %2380 = vrsqrt.f32 %v939_v16 }
 0x6b5   : > { %v2381_v17 = vpop.eup %2380 }
 0x6b6   : > { %v941_v18 = vmul.f32 %v2381_v17, %v929_v3 }
 0x6b8   : > { %943 = vrot.lane.b32.xlu1 %v941_v18, %s2504_s29  ;;  %s3082_s29 = sld [smem:[#allocation16_spill]] }
 0x6be   : > { %v724_v45 = vld [vmem:[%s3082_s29] sm:$0xff]  ;;  %s3086_s29 = smov 1  }
 0x6e6   : > { %v901_v19 = vpop.xlane.xlu0 %900 }
 0x6e7   : > { %v902_v20 = vmul.f32 0.055555556, %v901_v19 }
 0x6e9   : > { %v903_v21 = vadd.f32 1e-05, %v902_v20 }
 0x6eb   : > { %2382 = vrsqrt.f32 %v903_v21 }
 0x6f5   : > { %v2383_v22 = vpop.eup %2382 }
 0x6f6   : > { %v905_v23 = vmul.f32 %v2383_v22, %v897_v11 }
 0x6f8   : > { %907 = vrot.lane.b32.xlu0 %v905_v23, %s3049_s0  ;;  %s3081_s0 = sld [smem:[#allocation17_spill]] }
 0x6fe   : > { %v725_v31 = vld [vmem:[%s3081_s0] sm:$0xff] }
 0x72a   : > { %v944_v24 = vpop.permute.xlu1 %943 }
 0x72b   : > { %v946_v25 = vsel %vm910_vm9, 0.0, %v944_v24 }
 0x72c   : > { %v947_v26 = vsel %vm912_vm10, %v946_v25, 0.0 }
 0x72d   : > { %949 = vrot.lane.b32.xlu1 %v947_v26, %s3053_s24 }
 0x731   : > { %951 = vrot.lane.b32.xlu1 %v947_v26, %s3051_s30 }
 0x76a   : > { %v908_v27 = vpop.permute.xlu0 %907 }
 0x76b   : > { %v911_v28 = vsel %vm910_vm9, 0.0, %v908_v27 }
 0x76c   : > { %v913_v29 = vsel %vm912_vm10, %v911_v28, 0.0 }
 0x76d   : > { %915 = vrot.lane.b32.xlu0 %v913_v29, %s3053_s24  ;;  %s3084_s24 = smov 126  }
 0x771   : > { %918 = vrot.lane.b32.xlu0 %v913_v29, %s3051_s30  ;;  %s2508_s30 = smov 109  }
 0x775   : > { %967 = vperm.xlu0 %2345, %v725_v31  }
 0x79f   : > { %v950_v30 = vpop.permute.xlu1 %949 }
 0x7a0   : > { %v2340_v32 = vpack.i.bf16 %v950_v30, %v947_v26  ;;  %v1050_v26 = vld [vmem:[%s3030_s7] sm:$0xff] }
 0x7a2   : > { %2341 = vrot.lane.b32.xlu1 %v2340_v32, %s2501_s26 }
 0x7a3   : > { %v952_v33 = vpop.permute.xlu1 %951 }
 0x7a6   : > { %957 = vrot.lane.b32.xlu1 %v952_v33, %s2501_s26  ;;  %s2780_s26 = sshll.u32 %s2695_s28, 3  ;;  %s3083_s28 = smov 127  }
 0x7a7   : > { %s708_s0 = scalar_lea.vmem %s3041_s18, %s2780_s26 }
 0x7a8   : > { %v1047_v52 = vld [vmem:[%s708_s0] sm:$0xff]  ;;  %s3089_s0 = smov 106  }
 0x7df   : > { %v916_v38 = vpop.permute.xlu0 %915 }
 0x7e3   : > { %v919_v44 = vpop.permute.xlu0 %918 }
 0x7f4   : > { %v968_v47 = vpop.permute.xlu0 %967 }
 0x814   : > { %v2342_v34 = vpop.permute.xlu1 %2341 }
 0x815   : > { %v2344_v35 = vunpack.i.h.bf16 %v2342_v34  ;;  %v2343_v36 = vunpack.i.l.bf16 %v2342_v34 }
 0x817   : > { %v962_v40 = vsel %vm749_vm2, %v913_v29, %v2343_v36  ;;  %v963_v41 = vsel %vm749_vm2, %v916_v38, %v2344_v35 }
 0x818   : > { %v2240_v42 = vpack.c.bf16 %v963_v41, %v962_v40  ;;  %v958_v43 = vpop.permute.xlu1 %957  ;;  %v1049_v41 = vld [vmem:[%s3085_s6] sm:$0xff] }
 0x819   : > { %v964_v46 = vsel %vm749_vm2, %v919_v44, %v958_v43 }
 0x81a   : > { %2241 = vmatpush3.bf16.msra.mxu1 %v2240_v42 }
 0x81b   : > { %2178 = vmatprep.subr.mxu1 %v2499_v39 }
 0x81e   : > { %2179 = vmatpush3.msra.mxu1 %v964_v46 }
 0x81f   : > { %2181 = vmatmul.mubr.msk.f32.vlgmr.msra.gmra.mrb[0].mxu1 %vm970_vm11, %v724_v45  ;;  %2245 = vmatprep.subr.bf16.mxu1 %v2497_v37 }
 0x820   : > { %2198 = vmatprep.mubr.msk.f32.mxu1 %vm2498_vm3, %v2499_v39 }
 0x8f2   : > { %v1040_v48 = vpop.f32.mrb[0].mxu1 }
 0x8f3   : > { %v1041_v49 = vadd.f32 %v1040_v48, %v968_v47  ;;  %v2182_v50 = vpop.f32.mrb[1].mxu1 }
 0x8f5   : > { %vm1044_vm12 = vcmp.ge.f32.partialorder %v1041_v49, 0.0  ;;  %v1045_v51 = vmul.f32 0.01, %v1041_v49 }
 0x8f7   : > { %v1046_v54 = vsel %vm1044_vm12, %v1041_v49, %v1045_v51  ;;  %vm1852_vm12 = vcmask 203776  }
 0x8f8   : > { %v1048_v55 = vadd.f32 %v1047_v52, %v1046_v54 }
 0x8fa   : > { %v1081_v56 = vadd.f32 %v1048_v55, %v2701_v1  ;;  %v1053_v63 = vadd.f32 %v1048_v55, %v2707_v9 }
 0x8fc   : > { %1083 = vrot.lane.b32.xlu1 %v1081_v56, %s3057_s4  ;;  %v1054_v0 = vsel %vm749_vm2, %v1053_v63, 0.0 }
 0x96e   : > { %v1084_v57 = vpop.permute.xlu1 %1083 }
 0x96f   : > { %v1086_v58 = vsel %vm749_vm2, %v1084_v57, 0.0 }
 0x970   : > { %1087 = vadd.xlane.f32.xlu1 %v1086_v58 }
 0x9fd   : > { %v1088_v59 = vpop.xlane.xlu1 %1087 }
 0x9fe   : > { %v1089_v60 = vmul.f32 0.055555556, %v1088_v59 }
 0xa00   : > { %v1090_v61 = vsub.f32 %v1081_v56, %v1089_v60 }
 0xa02   : > { %v1091_v62 = vmul.f32 %v1090_v61, %v1090_v61 }
 0xa04   : > { %1093 = vrot.lane.b32.xlu0 %v1091_v62, %s3057_s4  ;;  %s712_s4 = scalar_lea.vmem %s3042_s19, %s2780_s26 }
 0xa23   : > { %1055 = vadd.xlane.f32.xlu0 %v1054_v0 }
 0xa76   : > { %v1094_v2 = vpop.permute.xlu0 %1093 }
 0xa77   : > { %v1096_v3 = vsel %vm749_vm2, %v1094_v2, 0.0 }
 0xa78   : > { %1097 = vadd.xlane.f32.xlu1 %v1096_v3 }
 0xab0   : > { %v1056_v4 = vpop.xlane.xlu0 %1055 }
 0xab1   : > { %v1057_v5 = vmul.f32 0.055555556, %v1056_v4 }
 0xab3   : > { %v1058_v6 = vsub.f32 %v1053_v63, %v1057_v5 }
 0xab5   : > { %v1059_v7 = vmul.f32 %v1058_v6, %v1058_v6 }
 0xab7   : > { %v1060_v8 = vsel %vm749_vm2, %v1059_v7, 0.0  ;;  %vm1385_vm2 = vcmask 179200  }
 0xab8   : > { %1061 = vadd.xlane.f32.xlu0 %v1060_v8 }
 0xb05   : > { %v1098_v10 = vpop.xlane.xlu1 %1097 }
 0xb06   : > { %v1099_v11 = vmul.f32 0.055555556, %v1098_v10 }
 0xb08   : > { %v1100_v12 = vadd.f32 1e-05, %v1099_v11 }
 0xb0a   : > { %2384 = vrsqrt.f32 %v1100_v12 }
 0xb14   : > { %v2385_v13 = vpop.eup %2384 }
 0xb15   : > { %v1102_v14 = vmul.f32 %v2385_v13, %v1090_v61 }
 0xb17   : > { %1104 = vrot.lane.b32.xlu1 %v1102_v14, %s2492_s22  ;;  %s3058_s22 = smov 108  }
 0xb45   : > { %v1062_v15 = vpop.xlane.xlu0 %1061 }
 0xb46   : > { %v1063_v16 = vmul.f32 0.055555556, %v1062_v15 }
 0xb48   : > { %v1064_v17 = vadd.f32 1e-05, %v1063_v16 }
 0xb4a   : > { %2386 = vrsqrt.f32 %v1064_v17 }
 0xb54   : > { %v2387_v18 = vpop.eup %2386 }
 0xb55   : > { %v1066_v19 = vmul.f32 %v2387_v18, %v1058_v6  ;;  %v1052_v18 = vld [vmem:[%s3032_s9] sm:$0xff] }
 0xb57   : > { %1068 = vrot.lane.b32.xlu0 %v1066_v19, %s3055_s1  ;;  %s3087_s1 = smov 110  }
 0xb89   : > { %v1105_v20 = vpop.permute.xlu1 %1104 }
 0xb8a   : > { %v1107_v21 = vsel %vm747_vm1, 0.0, %v1105_v20 }
 0xb8b   : > { %v1108_v22 = vsel %vm1072_vm13, %v1107_v21, 0.0 }
 0xb8c   : > { %1110 = vrot.lane.b32.xlu1 %v1108_v22, %s3083_s28 }
 0xb90   : > { %1112 = vrot.lane.b32.xlu1 %v1108_v22, %s3084_s24 }
 0xbc9   : > { %v1069_v23 = vpop.permute.xlu0 %1068 }
 0xbca   : > { %v1071_v24 = vsel %vm747_vm1, 0.0, %v1069_v23 }
 0xbcb   : > { %v1073_v25 = vsel %vm1072_vm13, %v1071_v24, 0.0 }
 0xbcc   : > { %1075 = vrot.lane.b32.xlu0 %v1073_v25, %s3083_s28 }
 0xbd0   : > { %1078 = vrot.lane.b32.xlu0 %v1073_v25, %s3084_s24 }
 0xbd4   : > { %1128 = vperm.xlu0 %2345, %v1050_v26  }
 0xbfe   : > { %v1111_v27 = vpop.permute.xlu1 %1110 }
 0xbff   : > { %v2346_v28 = vpack.i.bf16 %v1111_v27, %v1108_v22 }
 0xc01   : > { %2347 = vrot.lane.b32.xlu1 %v2346_v28, %s2506_s23 }
 0xc02   : > { %v1113_v29 = vpop.permute.xlu1 %1112 }
 0xc05   : > { %1118 = vrot.lane.b32.xlu1 %v1113_v29, %s2506_s23 }
 0xc3e   : > { %v1076_v33 = vpop.permute.xlu0 %1075 }
 0xc42   : > { %v1079_v40 = vpop.permute.xlu0 %1078 }
 0xc53   : > { %v1129_v43 = vpop.permute.xlu0 %1128 }
 0xc73   : > { %v2348_v30 = vpop.permute.xlu1 %2347 }
 0xc74   : > { %v2350_v31 = vunpack.i.h.bf16 %v2348_v30  ;;  %v2349_v32 = vunpack.i.l.bf16 %v2348_v30 }
 0xc76   : > { %v1123_v34 = vsel %vm1072_vm13, %v1073_v25, %v2349_v32  ;;  %v1124_v35 = vsel %vm1072_vm13, %v1076_v33, %v2350_v31  ;;  %v1051_v31 = vld [vmem:[%s3031_s8] sm:$0xff] }
 0xc77   : > { %v2243_v36 = vpack.c.bf16 %v1124_v35, %v1123_v34  ;;  %v1119_v38 = vpop.permute.xlu1 %1118 }
 0xc78   : > { %v1125_v42 = vsel %vm1072_vm13, %v1079_v40, %v1119_v38  ;;  %v1360_v40 = vld [vmem:[%s712_s4] sm:$0xff]  ;;  %s3088_s4 = smov 2  }
 0xc79   : > { %2244 = vmatpush3.bf16.msra.mxu0 %v2243_v36 }
 0xc7a   : > { %2187 = vmatprep.subr.mxu0 %v2499_v39 }
 0xc7d   : > { %2188 = vmatpush3.msra.mxu0 %v1125_v42 }
 0xc7e   : > { %2190 = vmatmul.mubr.msk.f32.vlgmr.msra.gmra.mrb[2].mxu0 %vm970_vm11, %v1049_v41  ;;  %2248 = vmatprep.subr.bf16.mxu0 %v2497_v37 }
 0xc7f   : > { %2207 = vmatprep.mubr.msk.f32.mxu0 %vm2498_vm3, %v2499_v39 }
 0xd51   : > { %v1200_v44 = vpop.f32.mrb[2].mxu0 }
 0xd52   : > { %v1201_v45 = vadd.f32 %v1200_v44, %v1129_v43  ;;  %v2191_v46 = vpop.f32.mrb[3].mxu0 }
 0xd54   : > { %vm1204_vm14 = vcmp.ge.f32.partialorder %v1201_v45, 0.0  ;;  %v1205_v47 = vmul.f32 0.01, %v1201_v45 }
 0xd56   : > { %v1206_v48 = vsel %vm1204_vm14, %v1201_v45, %v1205_v47 }
 0xd57   : > { %1236 = vrot.lane.b32.xlu1 %v1206_v48, %s3058_s22  ;;  %v1207_v56 = vsel %vm1072_vm13, %v1206_v48, 0.0 }
 0xdc9   : > { %v1237_v49 = vpop.permute.xlu1 %1236 }
 0xdca   : > { %v1239_v50 = vsel %vm1072_vm13, %v1237_v49, 0.0 }
 0xdcb   : > { %1240 = vadd.xlane.f32.xlu0 %v1239_v50 }
 0xe58   : > { %v1241_v51 = vpop.xlane.xlu0 %1240 }
 0xe59   : > { %v1242_v52 = vmul.f32 0.05, %v1241_v51 }
 0xe5b   : > { %v1243_v54 = vsub.f32 %v1206_v48, %v1242_v52 }
 0xe5d   : > { %v1244_v55 = vmul.f32 %v1243_v54, %v1243_v54 }
 0xe5f   : > { %1246 = vrot.lane.b32.xlu1 %v1244_v55, %s3058_s22 }
 0xe83   : > { %1208 = vadd.xlane.f32.xlu1 %v1207_v56 }
 0xed1   : > { %v1247_v57 = vpop.permute.xlu1 %1246 }
 0xed2   : > { %v1249_v58 = vsel %vm1072_vm13, %v1247_v57, 0.0 }
 0xed3   : > { %1250 = vadd.xlane.f32.xlu0 %v1249_v58 }
 0xf10   : > { %v1209_v59 = vpop.xlane.xlu1 %1208 }
 0xf11   : > { %v1211_v60 = vmul.f32 0.05, %v1209_v59 }
 0xf13   : > { %v1212_v61 = vsub.f32 %v1206_v48, %v1211_v60 }
 0xf15   : > { %v1213_v62 = vmul.f32 %v1212_v61, %v1212_v61 }
 0xf17   : > { %v1214_v63 = vsel %vm1072_vm13, %v1213_v62, 0.0 }
 0xf18   : > { %1215 = vadd.xlane.f32.xlu0 %v1214_v63 }
 0xf60   : > { %v1251_v0 = vpop.xlane.xlu0 %1250 }
 0xf61   : > { %v1252_v2 = vmul.f32 0.05, %v1251_v0 }
 0xf63   : > { %v1253_v3 = vadd.f32 1e-05, %v1252_v2 }
 0xf65   : > { %2388 = vrsqrt.f32 %v1253_v3 }
 0xf6f   : > { %v2389_v4 = vpop.eup %2388 }
 0xf70   : > { %v1255_v5 = vmul.f32 %v2389_v4, %v1243_v54 }
 0xf72   : > { %1257 = vrot.lane.b32.xlu0 %v1255_v5, %s2508_s30  ;;  %s3059_s30 = smov 106  }
 0xfa5   : > { %v1216_v6 = vpop.xlane.xlu0 %1215 }
 0xfa6   : > { %v1217_v7 = vmul.f32 0.05, %v1216_v6 }
 0xfa8   : > { %v1218_v8 = vadd.f32 1e-05, %v1217_v7 }
 0xfaa   : > { %2390 = vrsqrt.f32 %v1218_v8 }
 0xfb4   : > { %v2391_v10 = vpop.eup %2390 }
 0xfb5   : > { %v1220_v11 = vmul.f32 %v2391_v10, %v1212_v61 }
 0xfb7   : > { %1222 = vrot.lane.b32.xlu1 %v1220_v11, %s3086_s29 }
 0xfe4   : > { %v1258_v12 = vpop.permute.xlu0 %1257 }
 0xfe5   : > { %v1260_v13 = vsel %vm910_vm9, 0.0, %v1258_v12 }
 0xfe6   : > { %v1261_v14 = vsel %vm1226_vm15, %v1260_v13, 0.0 }
 0xfe7   : > { %1265 = vrot.lane.b32.xlu0 %v1261_v14, %s3084_s24  ;;  %1263 = vrot.lane.b32.xlu1 %v1261_v14, %s3083_s28 }
0x1029   : > { %v1223_v15 = vpop.permute.xlu1 %1222 }
0x102a   : > { %v1225_v16 = vsel %vm910_vm9, 0.0, %v1223_v15 }
0x102b   : > { %v1227_v17 = vsel %vm1226_vm15, %v1225_v16, 0.0 }
0x102c   : > { %1229 = vrot.lane.b32.xlu1 %v1227_v17, %s3083_s28 }
0x1030   : > { %1232 = vrot.lane.b32.xlu1 %v1227_v17, %s3084_s24 }
0x1034   : > { %1281 = vperm.xlu1 %2339, %v1052_v18  }
0x1059   : > { %v1264_v19 = vpop.permute.xlu1 %1263  ;;  %v1266_v21 = vpop.permute.xlu0 %1265 }
0x105a   : > { %v2351_v20 = vpack.i.bf16 %v1264_v19, %v1261_v14  ;;  %v1363_v14 = vld [vmem:[%s3034_s11] sm:$0xff] }
0x105c   : > { %2352 = vrot.lane.b32.xlu0 %v2351_v20, %s2506_s23 }
0x1060   : > { %1271 = vrot.lane.b32.xlu0 %v1266_v21, %s2506_s23  ;;  %s2509_s23 = smov 22  }
0x109e   : > { %v1230_v25 = vpop.permute.xlu1 %1229 }
0x10a2   : > { %v1233_v30 = vpop.permute.xlu1 %1232 }
0x10b3   : > { %v1282_v33 = vpop.permute.xlu1 %1281 }
0x10ce   : > { %v2353_v22 = vpop.permute.xlu0 %2352 }
0x10cf   : > { %v2355_v23 = vunpack.i.h.bf16 %v2353_v22  ;;  %v2354_v24 = vunpack.i.l.bf16 %v2353_v22 }
0x10d1   : > { %v1276_v26 = vsel %vm1072_vm13, %v1227_v17, %v2354_v24  ;;  %v1277_v27 = vsel %vm1072_vm13, %v1230_v25, %v2355_v23 }
0x10d2   : > { %v2246_v28 = vpack.c.bf16 %v1277_v27, %v1276_v26  ;;  %v1272_v29 = vpop.permute.xlu0 %1271  ;;  %v1362_v27 = vld [vmem:[%s3033_s10] sm:$0xff] }
0x10d3   : > { %v1278_v32 = vsel %vm1072_vm13, %v1233_v30, %v1272_v29 }
0x10d4   : > { %2247 = vmatpush3.bf16.msra.mxu1 %v2246_v28 }
0x10d5   : > { %2196 = vmatprep.subr.mxu1 %v2499_v39 }
0x10d8   : > { %2197 = vmatpush3.msra.mxu1 %v1278_v32 }
0x10d9   : > { %2199 = vmatmul.mubr.msk.f32.vlgmr.msra.gmra.mrb[2].mxu1 %vm970_vm11, %v1051_v31  ;;  %2251 = vmatprep.subr.bf16.mxu1 %v2497_v37 }
0x10da   : > { %2216 = vmatprep.mubr.msk.f32.mxu1 %vm2498_vm3, %v2499_v39 }
0x11ac   : > { %v1353_v34 = vpop.f32.mrb[2].mxu1 }
0x11ad   : > { %v1354_v35 = vadd.f32 %v1353_v34, %v1282_v33  ;;  %v2200_v36 = vpop.f32.mrb[3].mxu1 }
0x11af   : > { %vm1357_vm0 = vcmp.ge.f32.partialorder %v1354_v35, 0.0  ;;  %v1358_v38 = vmul.f32 0.01, %v1354_v35 }
0x11b1   : > { %v1359_v41 = vsel %vm1357_vm0, %v1354_v35, %v1358_v38 }
0x11b2   : > { %v1361_v42 = vadd.f32 %v1360_v40, %v1359_v41 }
0x11b4   : > { %v1394_v43 = vadd.f32 %v1361_v42, %v2701_v1  ;;  %v1366_v50 = vadd.f32 %v1361_v42, %v2707_v9 }
0x11b6   : > { %1396 = vrot.lane.b32.xlu0 %v1394_v43, %s3058_s22  ;;  %v1367_v51 = vsel %vm1072_vm13, %v1366_v50, 0.0 }
0x1228   : > { %v1397_v44 = vpop.permute.xlu0 %1396 }
0x1229   : > { %v1399_v45 = vsel %vm1072_vm13, %v1397_v44, 0.0 }
0x122a   : > { %1400 = vadd.xlane.f32.xlu1 %v1399_v45 }
0x12b7   : > { %v1401_v46 = vpop.xlane.xlu1 %1400 }
0x12b8   : > { %v1402_v47 = vmul.f32 0.05, %v1401_v46 }
0x12ba   : > { %v1403_v48 = vsub.f32 %v1394_v43, %v1402_v47 }
0x12bc   : > { %v1404_v49 = vmul.f32 %v1403_v48, %v1403_v48 }
0x12be   : > { %1406 = vrot.lane.b32.xlu0 %v1404_v49, %s3058_s22 }
0x12dd   : > { %1368 = vadd.xlane.f32.xlu0 %v1367_v51 }
0x1330   : > { %v1407_v52 = vpop.permute.xlu0 %1406 }
0x1331   : > { %v1409_v54 = vsel %vm1072_vm13, %v1407_v52, 0.0 }
0x1332   : > { %1410 = vadd.xlane.f32.xlu1 %v1409_v54 }
0x136a   : > { %v1369_v55 = vpop.xlane.xlu0 %1368 }
0x136b   : > { %v1370_v56 = vmul.f32 0.05, %v1369_v55 }
0x136d   : > { %v1371_v57 = vsub.f32 %v1366_v50, %v1370_v56 }
0x136f   : > { %v1372_v58 = vmul.f32 %v1371_v57, %v1371_v57 }
0x1371   : > { %v1373_v59 = vsel %vm1072_vm13, %v1372_v58, 0.0 }
0x1372   : > { %1374 = vadd.xlane.f32.xlu0 %v1373_v59 }
0x13bf   : > { %v1411_v60 = vpop.xlane.xlu1 %1410 }
0x13c0   : > { %v1412_v61 = vmul.f32 0.05, %v1411_v60 }
0x13c2   : > { %v1413_v62 = vadd.f32 1e-05, %v1412_v61 }
0x13c4   : > { %2392 = vrsqrt.f32 %v1413_v62 }
0x13ce   : > { %v2393_v63 = vpop.eup %2392 }
0x13cf   : > { %v1415_v0 = vmul.f32 %v2393_v63, %v1403_v48 }
0x13d1   : > { %1417 = vrot.lane.b32.xlu1 %v1415_v0, %s3087_s1  ;;  %s2511_s1 = smov 107  }
0x13ff   : > { %v1375_v2 = vpop.xlane.xlu0 %1374 }
0x1400   : > { %v1376_v3 = vmul.f32 0.05, %v1375_v2 }
0x1402   : > { %v1377_v4 = vadd.f32 1e-05, %v1376_v3 }
0x1404   : > { %2394 = vrsqrt.f32 %v1377_v4 }
0x140e   : > { %v2395_v5 = vpop.eup %2394 }
0x140f   : > { %v1379_v6 = vmul.f32 %v2395_v5, %v1371_v57  ;;  %v1365_v5 = vld [vmem:[%s3036_s13] sm:$0xff] }
0x1411   : > { %1381 = vrot.lane.b32.xlu0 %v1379_v6, %s3088_s4 }
0x1443   : > { %v1418_v7 = vpop.permute.xlu1 %1417 }
0x1444   : > { %v1420_v8 = vsel %vm747_vm1, 0.0, %v1418_v7 }
0x1445   : > { %v1421_v10 = vsel %vm1385_vm2, %v1420_v8, 0.0 }
0x1446   : > { %1423 = vrot.lane.b32.xlu1 %v1421_v10, %s3083_s28 }
0x144a   : > { %1425 = vrot.lane.b32.xlu1 %v1421_v10, %s3084_s24 }
0x1483   : > { %v1382_v11 = vpop.permute.xlu0 %1381 }
0x1484   : > { %v1384_v12 = vsel %vm747_vm1, 0.0, %v1382_v11 }
0x1485   : > { %v1386_v13 = vsel %vm1385_vm2, %v1384_v12, 0.0 }
0x1486   : > { %1388 = vrot.lane.b32.xlu0 %v1386_v13, %s3083_s28 }
0x148a   : > { %1391 = vrot.lane.b32.xlu0 %v1386_v13, %s3084_s24 }
0x148e   : > { %1441 = vperm.xlu0 %2345, %v1363_v14  }
0x14b8   : > { %v1424_v15 = vpop.permute.xlu1 %1423 }
0x14b9   : > { %v2356_v16 = vpack.i.bf16 %v1424_v15, %v1421_v10 }
0x14bb   : > { %2357 = vrot.lane.b32.xlu1 %v2356_v16, %s2509_s23 }
0x14bc   : > { %v1426_v17 = vpop.permute.xlu1 %1425 }
0x14bf   : > { %1431 = vrot.lane.b32.xlu1 %v1426_v17, %s2509_s23 }
0x14f8   : > { %v1389_v21 = vpop.permute.xlu0 %1388 }
0x14fc   : > { %v1392_v26 = vpop.permute.xlu0 %1391 }
0x150d   : > { %v1442_v29 = vpop.permute.xlu0 %1441 }
0x152d   : > { %v2358_v18 = vpop.permute.xlu1 %2357 }
0x152e   : > { %v2360_v19 = vunpack.i.h.bf16 %v2358_v18  ;;  %v2359_v20 = vunpack.i.l.bf16 %v2358_v18 }
0x1530   : > { %v1436_v22 = vsel %vm1385_vm2, %v1386_v13, %v2359_v20  ;;  %v1437_v23 = vsel %vm1385_vm2, %v1389_v21, %v2360_v19  ;;  %v1364_v19 = vld [vmem:[%s3035_s12] sm:$0xff] }
0x1531   : > { %v2249_v24 = vpack.c.bf16 %v1437_v23, %v1436_v22  ;;  %v1432_v25 = vpop.permute.xlu1 %1431 }
0x1532   : > { %v1438_v28 = vsel %vm1385_vm2, %v1392_v26, %v1432_v25 }
0x1533   : > { %2250 = vmatpush3.bf16.msra.mxu0 %v2249_v24 }
0x1534   : > { %2205 = vmatprep.subr.mxu0 %v2499_v39 }
0x1537   : > { %2206 = vmatpush3.msra.mxu0 %v1438_v28 }
0x1538   : > { %2208 = vmatmul.mubr.msk.f32.vlgmr.msra.gmra.mrb[4].mxu0 %vm970_vm11, %v1362_v27  ;;  %2254 = vmatprep.subr.bf16.mxu0 %v2497_v37 }
0x1539   : > { %2225 = vmatprep.mubr.msk.f32.mxu0 %vm2498_vm3, %v2499_v39 }
0x160b   : > { %v1513_v30 = vpop.f32.mrb[4].mxu0 }
0x160c   : > { %v1514_v31 = vadd.f32 %v1513_v30, %v1442_v29  ;;  %v2209_v32 = vpop.f32.mrb[5].mxu0 }
0x160e   : > { %vm1517_vm5 = vcmp.ge.f32.partialorder %v1514_v31, 0.0  ;;  %v1518_v33 = vmul.f32 0.01, %v1514_v31 }
0x1610   : > { %v1519_v34 = vsel %vm1517_vm5, %v1514_v31, %v1518_v33 }
0x1611   : > { %1549 = vrot.lane.b32.xlu1 %v1519_v34, %s3059_s30  ;;  %v1520_v43 = vsel %vm1385_vm2, %v1519_v34, 0.0 }
0x1683   : > { %v1550_v35 = vpop.permute.xlu1 %1549 }
0x1684   : > { %v1552_v36 = vsel %vm1385_vm2, %v1550_v35, 0.0 }
0x1685   : > { %1553 = vadd.xlane.f32.xlu0 %v1552_v36 }
0x1712   : > { %v1554_v38 = vpop.xlane.xlu0 %1553 }
0x1713   : > { %v1555_v40 = vmul.f32 0.045454547, %v1554_v38 }
0x1715   : > { %v1556_v41 = vsub.f32 %v1519_v34, %v1555_v40 }
0x1717   : > { %v1557_v42 = vmul.f32 %v1556_v41, %v1556_v41 }
0x1719   : > { %1559 = vrot.lane.b32.xlu1 %v1557_v42, %s3059_s30  ;;  %s716_s30 = scalar_lea.vmem %s3043_s20, %s2780_s26  ;;  %s3090_s26 = smov 108  }
0x171a   : > { %v1673_v26 = vld [vmem:[%s716_s30] sm:$0xff]  ;;  %s2512_s30 = smov 24  }
0x173d   : > { %1521 = vadd.xlane.f32.xlu1 %v1520_v43 }
0x178b   : > { %v1560_v44 = vpop.permute.xlu1 %1559 }
0x178c   : > { %v1562_v45 = vsel %vm1385_vm2, %v1560_v44, 0.0 }
0x178d   : > { %1563 = vadd.xlane.f32.xlu0 %v1562_v45 }
0x17ca   : > { %v1522_v46 = vpop.xlane.xlu1 %1521 }
0x17cb   : > { %v1524_v47 = vmul.f32 0.045454547, %v1522_v46 }
0x17cd   : > { %v1525_v48 = vsub.f32 %v1519_v34, %v1524_v47 }
0x17cf   : > { %v1526_v49 = vmul.f32 %v1525_v48, %v1525_v48 }
0x17d1   : > { %v1527_v50 = vsel %vm1385_vm2, %v1526_v49, 0.0 }
0x17d2   : > { %1528 = vadd.xlane.f32.xlu0 %v1527_v50 }
0x181a   : > { %v1564_v51 = vpop.xlane.xlu0 %1563 }
0x181b   : > { %v1565_v52 = vmul.f32 0.045454547, %v1564_v51 }
0x181d   : > { %v1566_v54 = vadd.f32 1e-05, %v1565_v52 }
0x181f   : > { %2396 = vrsqrt.f32 %v1566_v54 }
0x1829   : > { %v2397_v55 = vpop.eup %2396 }
0x182a   : > { %v1568_v56 = vmul.f32 %v2397_v55, %v1556_v41 }
0x182c   : > { %1570 = vrot.lane.b32.xlu0 %v1568_v56, %s2511_s1  ;;  %s2134_s1 = sshll.u32 %s2647_s3, 6 }
0x185f   : > { %v1529_v57 = vpop.xlane.xlu0 %1528 }
0x1860   : > { %v1530_v58 = vmul.f32 0.045454547, %v1529_v57 }
0x1862   : > { %v1531_v59 = vadd.f32 1e-05, %v1530_v58 }
0x1864   : > { %2398 = vrsqrt.f32 %v1531_v59 }
0x186e   : > { %v2399_v60 = vpop.eup %2398 }
0x186f   : > { %v1533_v61 = vmul.f32 %v2399_v60, %v1525_v48 }
0x1871   : > { %1535 = vrot.lane.b32.xlu1 %v1533_v61, %s3086_s29  ;;  %v1676_v61 = vld [vmem:[%s3038_s15] sm:$0xf] }
0x189e   : > { %v1571_v62 = vpop.permute.xlu0 %1570 }
0x189f   : > { %v1573_v63 = vsel %vm910_vm9, 0.0, %v1571_v62 }
0x18a0   : > { %v1574_v0 = vsel %vm1539_vm8, %v1573_v63, 0.0 }
0x18a1   : > { %1578 = vrot.lane.b32.xlu0 %v1574_v0, %s3084_s24  ;;  %1576 = vrot.lane.b32.xlu1 %v1574_v0, %s3083_s28 }
0x18e3   : > { %v1536_v2 = vpop.permute.xlu1 %1535 }
0x18e4   : > { %v1538_v3 = vsel %vm910_vm9, 0.0, %v1536_v2 }
0x18e5   : > { %v1540_v4 = vsel %vm1539_vm8, %v1538_v3, 0.0 }
0x18e6   : > { %1542 = vrot.lane.b32.xlu1 %v1540_v4, %s3083_s28 }
0x18ea   : > { %1545 = vrot.lane.b32.xlu1 %v1540_v4, %s3084_s24 }
0x18ee   : > { %1594 = vperm.xlu1 %2339, %v1365_v5  }
0x1913   : > { %v1577_v6 = vpop.permute.xlu1 %1576  ;;  %v1579_v8 = vpop.permute.xlu0 %1578 }
0x1914   : > { %v2361_v7 = vpack.i.bf16 %v1577_v6, %v1574_v0 }
0x1916   : > { %2362 = vrot.lane.b32.xlu0 %v2361_v7, %s2509_s23 }
0x191a   : > { %1584 = vrot.lane.b32.xlu0 %v1579_v8, %s2509_s23 }
0x1958   : > { %v1543_v13 = vpop.permute.xlu1 %1542 }
0x195c   : > { %v1546_v18 = vpop.permute.xlu1 %1545 }
0x196d   : > { %v1595_v21 = vpop.permute.xlu1 %1594 }
0x1988   : > { %v2363_v10 = vpop.permute.xlu0 %2362 }
0x1989   : > { %v2365_v11 = vunpack.i.h.bf16 %v2363_v10  ;;  %v2364_v12 = vunpack.i.l.bf16 %v2363_v10 }
0x198b   : > { %v1589_v14 = vsel %vm1385_vm2, %v1540_v4, %v2364_v12  ;;  %v1590_v15 = vsel %vm1385_vm2, %v1543_v13, %v2365_v11  ;;  %v1675_v12 = vld [vmem:[%s3037_s14] sm:$0xf] }
0x198c   : > { %v2252_v16 = vpack.c.bf16 %v1590_v15, %v1589_v14  ;;  %v1585_v17 = vpop.permute.xlu0 %1584 }
0x198d   : > { %v1591_v20 = vsel %vm1385_vm2, %v1546_v18, %v1585_v17 }
0x198e   : > { %2253 = vmatpush3.bf16.msra.mxu1 %v2252_v16 }
0x198f   : > { %2214 = vmatprep.subr.mxu1 %v2499_v39 }
0x1992   : > { %2215 = vmatpush3.msra.mxu1 %v1591_v20 }
0x1993   : > { %2217 = vmatmul.mubr.msk.f32.vlgmr.msra.gmra.mrb[4].mxu1 %vm970_vm11, %v1364_v19  ;;  %2257 = vmatprep.subr.bf16.mxu1 %v2497_v37 }
0x1994   : > { %2232 = vmatprep.mubr.msk.f32.mxu1 %vm2498_vm3, %v2499_v39  ;;  %vm1832_vm3 = vcmask 191488  }
0x1a66   : > { %v1666_v22 = vpop.f32.mrb[4].mxu1 }
0x1a67   : > { %v1667_v23 = vadd.f32 %v1666_v22, %v1595_v21  ;;  %v2218_v24 = vpop.f32.mrb[5].mxu1 }
0x1a69   : > { %vm1670_vm10 = vcmp.ge.f32.partialorder %v1667_v23, 0.0  ;;  %v1671_v25 = vmul.f32 0.01, %v1667_v23 }
0x1a6b   : > { %v1672_v27 = vsel %vm1670_vm10, %v1667_v23, %v1671_v25 }
0x1a6c   : > { %v1674_v28 = vadd.f32 %v1673_v26, %v1672_v27 }
0x1a6e   : > { %v1706_v29 = vadd.f32 %v1674_v28, %v2701_v1  ;;  %v1679_v35 = vadd.f32 %v1674_v28, %v2707_v9 }
0x1a70   : > { %1708 = vrot.lane.b32.xlu0 %v1706_v29, %s3089_s0  ;;  %v1680_v36 = vsel %vm1385_vm2, %v1679_v35, 0.0 }
0x1ae2   : > { %v1709_v37 = vpop.permute.xlu0 %1708 }
0x1ae3   : > { %v1711_v30 = vsel %vm1385_vm2, %v1709_v37, 0.0 }
0x1ae4   : > { %1712 = vadd.xlane.f32.xlu1 %v1711_v30 }
0x1b71   : > { %v1713_v31 = vpop.xlane.xlu1 %1712 }
0x1b72   : > { %v1714_v32 = vmul.f32 0.045454547, %v1713_v31 }
0x1b74   : > { %v1715_v33 = vsub.f32 %v1706_v29, %v1714_v32 }
0x1b76   : > { %v1716_v34 = vmul.f32 %v1715_v33, %v1715_v33 }
0x1b78   : > { %1718 = vrot.lane.b32.xlu0 %v1716_v34, %s3089_s0  ;;  %s2513_s0 = smov 104  }
0x1b97   : > { %1681 = vadd.xlane.f32.xlu0 %v1680_v36 }
0x1bea   : > { %v1719_v38 = vpop.permute.xlu0 %1718 }
0x1beb   : > { %v1721_v1 = vsel %vm1385_vm2, %v1719_v38, 0.0 }
0x1bec   : > { %1722 = vadd.xlane.f32.xlu1 %v1721_v1 }
0x1c24   : > { %v1682_v40 = vpop.xlane.xlu0 %1681 }
0x1c25   : > { %v1683_v41 = vmul.f32 0.045454547, %v1682_v40 }
0x1c27   : > { %v1684_v42 = vsub.f32 %v1679_v35, %v1683_v41 }
0x1c29   : > { %v1685_v43 = vmul.f32 %v1684_v42, %v1684_v42 }
0x1c2b   : > { %v1686_v44 = vsel %vm1385_vm2, %v1685_v43, 0.0 }
0x1c2c   : > { %1687 = vadd.xlane.f32.xlu0 %v1686_v44 }
0x1c79   : > { %v1723_v45 = vpop.xlane.xlu1 %1722 }
0x1c7a   : > { %v1724_v46 = vmul.f32 0.045454547, %v1723_v45 }
0x1c7c   : > { %v1725_v47 = vadd.f32 1e-05, %v1724_v46 }
0x1c7e   : > { %2400 = vrsqrt.f32 %v1725_v47 }
0x1c88   : > { %v2401_v48 = vpop.eup %2400 }
0x1c89   : > { %v1727_v9 = vmul.f32 %v2401_v48, %v1715_v33 }
0x1c8b   : > { %1729 = vrot.lane.b32.xlu1 %v1727_v9, %s3090_s26  ;;  %s2514_s26 = smov 105  }
0x1cb9   : > { %v1688_v49 = vpop.xlane.xlu0 %1687 }
0x1cba   : > { %v1689_v50 = vmul.f32 0.045454547, %v1688_v49 }
0x1cbc   : > { %v1690_v51 = vadd.f32 1e-05, %v1689_v50  ;;  %v1678_v50 = vld [vmem:[%s3040_s17] sm:$0xf] }
0x1cbe   : > { %2402 = vrsqrt.f32 %v1690_v51 }
0x1cc8   : > { %v2403_v52 = vpop.eup %2402 }
0x1cc9   : > { %v1692_v54 = vmul.f32 %v2403_v52, %v1684_v42 }
0x1ccb   : > { %1694 = vrot.lane.b32.xlu0 %v1692_v54, %s3088_s4  ;;  %s2981_s4 = scalar_lea.hbm %s3044_s21, %s2134_s1 }
0x1cfd   : > { %v1730_v55 = vpop.permute.xlu1 %1729 }
0x1cfe   : > { %v1732_v56 = vsel %vm747_vm1, 0.0, %v1730_v55 }
0x1cff   : > { %v1733_v57 = vsel %vm970_vm11, %v1732_v56, 0.0 }
0x1d00   : > { %1735 = vrot.lane.b32.xlu1 %v1733_v57, %s3083_s28 }
0x1d04   : > { %1737 = vrot.lane.b32.xlu1 %v1733_v57, %s3084_s24 }
0x1d3d   : > { %v1695_v58 = vpop.permute.xlu0 %1694 }
0x1d3e   : > { %v1697_v59 = vsel %vm747_vm1, 0.0, %v1695_v58 }
0x1d3f   : > { %v1698_v60 = vsel %vm970_vm11, %v1697_v59, 0.0 }
0x1d40   : > { %1700 = vrot.lane.b32.xlu0 %v1698_v60, %s3083_s28 }
0x1d44   : > { %1703 = vrot.lane.b32.xlu0 %v1698_v60, %s3084_s24 }
0x1d48   : > { %1753 = vperm.xlu0 %2345, %v1676_v61  }
0x1d72   : > { %v1736_v62 = vpop.permute.xlu1 %1735 }
0x1d73   : > { %v2366_v63 = vpack.i.bf16 %v1736_v62, %v1733_v57 }
0x1d75   : > { %2367 = vrot.lane.b32.xlu1 %v2366_v63, %s2512_s30 }
0x1d76   : > { %v1738_v0 = vpop.permute.xlu1 %1737 }
0x1d79   : > { %1743 = vrot.lane.b32.xlu1 %v1738_v0, %s2512_s30 }
0x1db2   : > { %v1701_v5 = vpop.permute.xlu0 %1700 }
0x1db6   : > { %v1704_v11 = vpop.permute.xlu0 %1703 }
0x1dc7   : > { %v1754_v14 = vpop.permute.xlu0 %1753 }
0x1de7   : > { %v2368_v2 = vpop.permute.xlu1 %2367 }
0x1de8   : > { %v2370_v3 = vunpack.i.h.bf16 %v2368_v2  ;;  %v2369_v4 = vunpack.i.l.bf16 %v2368_v2  ;;  %v1677_v2 = vld [vmem:[%s3039_s16] sm:$0xf] }
0x1dea   : > { %v1748_v6 = vsel %vm970_vm11, %v1698_v60, %v2369_v4  ;;  %v1749_v7 = vsel %vm970_vm11, %v1701_v5, %v2370_v3 }
0x1deb   : > { %v2255_v8 = vpack.c.bf16 %v1749_v7, %v1748_v6  ;;  %v1744_v10 = vpop.permute.xlu1 %1743 }
0x1dec   : > { %v1750_v13 = vsel %vm970_vm11, %v1704_v11, %v1744_v10 }
0x1ded   : > { %2256 = vmatpush3.bf16.msra.mxu0 %v2255_v8 }
0x1dee   : > { %2223 = vmatprep.subr.mxu0 %v2499_v39 }
0x1df1   : > { %2224 = vmatpush3.msra.mxu0 %v1750_v13 }
0x1df2   : > { %2226 = vmatmul.mubr.msk.f32.vlgmr.msra.gmra.mrb[6].mxu0 %vm970_vm11, %v1675_v12 }
0x1ec5   : > { %v1825_v15 = vpop.f32.mrb[6].mxu0 }
0x1ec6   : > { %v1826_v16 = vadd.f32 %v1825_v15, %v1754_v14  ;;  %v2227_v17 = vpop.f32.mrb[7].mxu0 }
0x1ec8   : > { %vm1829_vm1 = vcmp.ge.f32.partialorder %v1826_v16, 0.0  ;;  %v1830_v18 = vmul.f32 0.01, %v1826_v16 }
0x1eca   : > { %v1831_v19 = vsel %vm1829_vm1, %v1826_v16, %v1830_v18 }
0x1ecb   : > { %1864 = vrot.lane.b32.xlu1 %v1831_v19, %s2513_s0  ;;  %v1833_v25 = vsel %vm1832_vm3, %v1831_v19, 0.0 }
0x1f3d   : > { %v1865_v39 = vpop.permute.xlu1 %1864 }
0x1f3e   : > { %v1867_v20 = vsel %vm1832_vm3, %v1865_v39, 0.0 }
0x1f3f   : > { %1868 = vadd.xlane.f32.xlu0 %v1867_v20 }
0x1fcc   : > { %v1869_v21 = vpop.xlane.xlu0 %1868 }
0x1fcd   : > { %v1870_v22 = vmul.f32 0.041666668, %v1869_v21 }
0x1fcf   : > { %v1871_v23 = vsub.f32 %v1831_v19, %v1870_v22 }
0x1fd1   : > { %v1872_v24 = vmul.f32 %v1871_v23, %v1871_v23 }
0x1fd3   : > { %1874 = vrot.lane.b32.xlu1 %v1872_v24, %s2513_s0 }
0x1ff7   : > { %1834 = vadd.xlane.f32.xlu1 %v1833_v25 }
0x2045   : > { %v1875_v26 = vpop.permute.xlu1 %1874 }
0x2046   : > { %v1877_v27 = vsel %vm1832_vm3, %v1875_v26, 0.0 }
0x2047   : > { %1878 = vadd.xlane.f32.xlu0 %v1877_v27 }
0x2084   : > { %v1835_v28 = vpop.xlane.xlu1 %1834 }
0x2085   : > { %v1837_v29 = vmul.f32 0.041666668, %v1835_v28 }
0x2087   : > { %v1838_v37 = vsub.f32 %v1831_v19, %v1837_v29 }
0x2089   : > { %v1839_v30 = vmul.f32 %v1838_v37, %v1838_v37 }
0x208b   : > { %v1840_v31 = vsel %vm1832_vm3, %v1839_v30, 0.0 }
0x208c   : > { %1841 = vadd.xlane.f32.xlu0 %v1840_v31 }
0x20d4   : > { %v1879_v32 = vpop.xlane.xlu0 %1878 }
0x20d5   : > { %v1880_v33 = vmul.f32 0.041666668, %v1879_v32 }
0x20d7   : > { %v1881_v34 = vadd.f32 1e-05, %v1880_v33 }
0x20d9   : > { %2404 = vrsqrt.f32 %v1881_v34 }
0x20e3   : > { %v2405_v35 = vpop.eup %2404 }
0x20e4   : > { %v1883_v36 = vmul.f32 %v2405_v35, %v1871_v23 }
0x20e6   : > { %1885 = vrot.lane.b32.xlu0 %v1883_v36, %s2514_s26 }
0x2119   : > { %v1842_v38 = vpop.xlane.xlu0 %1841 }
0x211a   : > { %v1843_v1 = vmul.f32 0.041666668, %v1842_v38 }
0x211c   : > { %v1844_v40 = vadd.f32 1e-05, %v1843_v1 }
0x211e   : > { %2406 = vrsqrt.f32 %v1844_v40 }
0x2128   : > { %v2407_v41 = vpop.eup %2406 }
0x2129   : > { %v1846_v42 = vmul.f32 %v2407_v41, %v1838_v37 }
0x212b   : > { %1848 = vrot.lane.b32.xlu1 %v1846_v42, %s3086_s29  ;;  %s698_s29 = sand.u32 1, %s2481_s25  }
0x2158   : > { %v1886_v43 = vpop.permute.xlu0 %1885 }
0x2159   : > { %v1888_v44 = vsel %vm910_vm9, 0.0, %v1886_v43 }
0x215a   : > { %v1889_v45 = vsel %vm1852_vm12, %v1888_v44, 0.0 }
0x215b   : > { %v1891_v46 = vrot.slane %v1889_v45, 4  ;;  %1895 = vrot.lane.b32.xlu0 %v1889_v45, %s3084_s24 }
0x215d   : > { %1892 = vrot.lane.b32.xlu1 %v1891_v46, %s3083_s28 }
0x219d   : > { %v1849_v47 = vpop.permute.xlu1 %1848 }
0x219e   : > { %v1851_v48 = vsel %vm910_vm9, 0.0, %v1849_v47 }
0x219f   : > { %v1853_v9 = vsel %vm1852_vm12, %v1851_v48, 0.0 }
0x21a0   : > { %v1855_v49 = vrot.slane %v1853_v9, 4  ;;  %1859 = vrot.lane.b32.xlu0 %v1853_v9, %s3084_s24  ;;  %s2515_s24 = smov [#allocation5]  }
0x21a2   : > { %1856 = vrot.lane.b32.xlu1 %v1855_v49, %s3083_s28  ;;  %s1991_s28 = scalar_lea.sflag [#allocation3], %s698_s29 }
0x21a4   : > { %1909 = vperm.xlu0 %2345, %v1678_v50  }
0x21cd   : > { %v1896_v52 = vpop.permute.xlu0 %1895 }
0x21cf   : > { %v1893_v51 = vpop.permute.xlu1 %1892 }
0x21d0   : > { %v1897_v54 = vsel %vm759_vm4, %v1889_v45, %v1893_v51 }
0x21d1   : > { %v2371_v55 = vpack.i.bf16 %v1896_v52, %v1897_v54 }
0x21d3   : > { %2372 = vrot.lane.b32.xlu1 %v2371_v55, %s2512_s30  ;;  %s2117_s30 = sshll.u32 %s698_s29, 2 }
0x21d4   : > { %s700_s23 = scalar_lea.vmem [#allocation5], %s2117_s30  ;;  %s2427_s30 = sshll.u32 %s2515_s24, 4  ;;  %s2428_s30 = int_to_ptr.vmem [resolvable:$false] %s2427_s30 }
0x21d5   : > { %s2004_s0 = sshll.u32 %s700_s23, 4  ;;  %s2429_s6 = scalar_lea.vmem %s2428_s30, 128  ;;  %s2983_s0 = int_to_ptr.vmem [resolvable:$true] %s2004_s0 }
0x21d6   : > { %s2423_s3 = scalar_lea.vmem %s2983_s0, 64  ;;  %p2430_p13 = scmp.lt.s32.totalorder %s2983_s0, %s2428_s30 }
0x21d7   : > { %p2424_p9 = scmp.ne.s32.totalorder %s2983_s0, %s2423_s3  ;;  %p2431_p0 = scmp.lt.s32.totalorder %s2429_s6, %s2423_s3 }
0x21d9   : > { %p2425_p10 = pnand %p2424_p9, %p2664_p5  ;;  %p2432_p1 = por %p2431_p0, %p2430_p13 }
0x21db   : > { %p2426_p12 = pneg %p2425_p10 }
0x21dd   : > { %p2433_p2 = pnand %p2432_p1, %p2426_p12 }
0x2212   : > { %v1860_v60 = vpop.permute.xlu0 %1859 }
0x2214   : > { %v1857_v56 = vpop.permute.xlu1 %1856 }
0x2215   : > { %v1862_v61 = vsel %vm759_vm4, %v1853_v9, %v1857_v56  ;;  %vm1988_vm4 = vcmask 388096  }
0x2223   : > { %v1910_v3 = vpop.permute.xlu0 %1909 }
0x2245   : > { %v2373_v57 = vpop.permute.xlu1 %2372 }
0x2246   : > { %v2375_v58 = vunpack.i.h.bf16 %v2373_v57  ;;  %v2374_v59 = vunpack.i.l.bf16 %v2373_v57 }
0x2248   : > { %v1906_v62 = vsel %vm970_vm11, %v1860_v60, %v2375_v58  ;;  %v1905_v63 = vsel %vm970_vm11, %v1862_v61, %v2374_v59 }
0x2249   : > { %v2258_v0 = vpack.c.bf16 %v1906_v62, %v1905_v63 }
0x224b   : > { %2260 = vmatpush3.bf16.msk.msra.mxu1 %vm2737_vm6, %v2258_v0 }
0x224e   : > { %2233 = vmatmul.mubr.msk.f32.vlgmr.msra.gmra.mrb[6].mxu1 %vm812_vm7, %v1677_v2 }
0x2321   : > { %v1984_v4 = vpop.f32.mrb[6].mxu1 }
0x2322   : > { %v1985_v5 = vadd.f32 %v1984_v4, %v1910_v3  ;;  %v2234_v6 = vpop.f32.mrb[7].mxu1 }
0x2324   : > { %1989 = vst.msk [vmem:[%s700_s23] sm:$0xf] %vm1988_vm4, %v1985_v5 }
0x2325   : > { %2436 = shalt.err (!%p2433_p2)
}
0x2326   : > { %s2437_s29 = scalar_lea.hbm %s2981_s4, 64  ;;  %s2441_s26 = scalar_lea.hbm %s3044_s21, 128 }
0x2327   : > { %p2438_p3 = scmp.ne.s32.totalorder %s2981_s4, %s2437_s29  ;;  %p2442_p8 = scmp.lt.u32.totalorder %s2981_s4, %s3044_s21 }
0x2328   : > { %p2443_p11 = scmp.lt.u32.totalorder %s2441_s26, %s2437_s29  ;;  %p2445_p10 = scmp.lt.u32.totalorder %s2437_s29, %s2981_s4 }
0x2329   : > { %p2439_p4 = pnand %p2438_p3, %p2664_p5 }
0x232a   : > { %p2444_p9 = por %p2443_p11, %p2442_p8 }
0x232b   : > { %p2440_p7 = pneg %p2439_p4 }
0x232c   : > { %p2446_p12 = por %p2445_p10, %p2444_p9 }
0x232e   : > { %p2447_p13 = pnand %p2446_p12, %p2440_p7 }
0x2330   : > { %2450 = shalt.err (!%p2447_p13)
}
0x2331   : > { %2265 = dma.vmem_to_hbm [thread:$0]  (%p2664_p5), %s2983_s0, 64, %s2981_s4, %s1991_s28  }
0x2332 PF: > { %p2277_p0 = scmp.ge.s32.totalorder %s2489_s27, 2  ;;  %s2016_s3 = sand.u32 1, %s2477_s2  }
0x2333   : > { %s2017_s30 = scalar_lea.sflag [#allocation3], %s2016_s3 }
0x2334   : > { %p2272_p1 = pnand %p2277_p0, %p2668_p6 }
0x2336   : > { %2472 = dma.done.wait (!%p2272_p1), %s2017_s30, 64  }
0x2337   : > { %2474 = vsyncadd (!%p2272_p1), %s2017_s30, 4294967232  ;;  %s3092_s27 = sld [smem:[#allocation9_spill]]  ;;  %s3093_s29 = sld [smem:[#allocation8_spill]] }
0x2338   : > { %s3094_s26 = sld [smem:[#allocation10_spill]]  ;;  %s3095_s2 = smov %s2481_s25 }
0x233d   : > { %p32_p2 = scmp.ge.s32.totalorder %s3092_s27, 4   ;;  %s3096_s25 = smov %s3093_s29 }
0x233f   :  { %34 = sbr.rel (!%p32_p2) target bundleno = 12 (0xc), region = 153 }
0x2346   :  { %2022 = vsyncpa [#allocation3], 1 }
0x2347   :  { %2024 = vsyncpa [#allocation3 + $0x1], 1 }
0x2348   :  { %2025 = vsyncpa [#allocation4], 1 }
0x2349   :  { %2027 = vsyncpa [#allocation4 + $0x1], 1 }

</bundles_post_ra>
